<compile_context>
chip_gen: v7x
topology: tpu7x:2x2x1
jax: 0.10.0
libtpu: 0.0.40
codegen_flags: <defaults>
</compile_context>

<pallas_src>
import jax
import jax.numpy as jnp
from jax import lax
from jax.experimental import pallas as pl
from jax.experimental.pallas import tpu as pltpu


def _make_kernel(Nb, Lp, L, Cin, Cout, growth, K, pad, conv_dtype):
    Ctot = Cin + growth

    def kernel(x_ref, w1_ref, w2_ref, shift_ref, out_ref):
        x = x_ref[...]                                    # (Nb*Cin, Lp) fp32
        xr = jnp.maximum(x, 0.0)                          # relu(x)
        lane = lax.broadcasted_iota(jnp.int32, (1, Lp), 1)

        def shift_l(v, d):
            """u[:, l] = v[:, l + d], zeros outside [0, Lp).  d is a static int."""
            if d == 0:
                return v
            # roll(v, s)[:, l] = v[:, (l - s) % Lp]  ->  s = -d (mod Lp)
            r = pltpu.roll(v, shift=(-d) % Lp, axis=1)
            mask = (lane < (Lp - d)) if d > 0 else (lane >= (-d))
            return jnp.where(mask, r, jnp.zeros_like(r))

        def grouped_conv(w_taps_ref, act):
            # Per-tap MXU accumulation: accumulate K small dots instead of one big
            # dot over a materialized K-tap concat (saves ~Kx VMEM + all its vst/vld).
            acc = None
            for k in range(K):
                tap = shift_l(act, k - pad).astype(conv_dtype)
                p = jnp.dot(w_taps_ref[k], tap, preferred_element_type=jnp.float32)
                acc = p if acc is None else acc + p
            return acc                                    # fp32

        # ---- conv1 (grouped, 'same', no bias) with folded BN scale ----
        h = grouped_conv(w1_ref, xr)                      # (Nb*Cout, Lp)

        # ---- BN additive shift (per out-channel, replicated over batch) + relu ----
        h = jnp.maximum(h + shift_ref[...], 0.0)
        if Lp != L:
            # Zero the lane-padding columns so conv2's right-edge taps see the same
            # zeros the reference 'same' padding would (shift makes them nonzero).
            h = jnp.where(lane < L, h, 0.0)

        # ---- conv2 (grouped, 'same', no bias) ----
        y = grouped_conv(w2_ref, h)                       # (Nb*growth, Lp)

        # ---- cat([x, xn], dim=1): aligned slice stores, no concatenation.
        # The passthrough is relu(x) because nn.ReLU(inplace=True) mutates x.
        for b in range(Nb):
            out_ref[b * Ctot:b * Ctot + Cin, :] = xr[b * Cin:(b + 1) * Cin, :]
            out_ref[b * Ctot + Cin:(b + 1) * Ctot, :] = y[b * growth:(b + 1) * growth, :]

    return kernel


def make_encoder_layer(w1, w2, bn_gamma, bn_beta, bn_mean, bn_var, *,
                       groups, pad, eps=1e-5, batch_block=4,
                       conv_dtype=jnp.float32):
    """Precompute (hoist) packed weights once; return a jitted forward(x).

    w1: (Cout, Cin/groups, K), w2: (growth, Cout/groups, K), bn_*: (Cout,).
    """
    f32 = jnp.float32
    Cout, Cin_g, K = w1.shape
    growth, Cout_g, K2 = w2.shape
    assert K == K2 == 2 * pad + 1
    Cin = Cin_g * groups
    assert Cout % groups == 0 and growth % groups == 0 and Cout_g * groups == Cout
    Nb = batch_block
    Ctot = Cin + growth

    # ---- fold eval-mode BN into (scale on conv1 output channels) + additive shift ----
    inv_std = 1.0 / jnp.sqrt(bn_var.astype(f32) + eps)
    scale = bn_gamma.astype(f32) * inv_std                       # (Cout,)
    shift = bn_beta.astype(f32) - bn_mean.astype(f32) * scale    # (Cout,)

    # ---- per-tap, group-block-diagonal full weights ----
    eye_g = jnp.eye(groups, dtype=f32)
    w1_g = w1.astype(f32).reshape(groups, Cout // groups, Cin_g, K)
    W1_full = jnp.einsum('gG,gock->kgoGc', eye_g, w1_g).reshape(K, Cout, Cin)
    W1_full = W1_full * scale[None, :, None]                     # fold BN scale
    w2_g = w2.astype(f32).reshape(groups, growth // groups, Cout_g, K)
    W2_full = jnp.einsum('gG,gock->kgoGc', eye_g, w2_g).reshape(K, growth, Cout)

    # ---- replicate block-diagonally over the Nb samples of one grid block.
    # Row layout inside a block: row = b*C + c, matching the folded (N*C, L) input. ----
    eye_b = jnp.eye(Nb, dtype=f32)
    W1_taps = jnp.einsum('bB,koc->kboBc', eye_b, W1_full) \
        .reshape(K, Nb * Cout, Nb * Cin).astype(conv_dtype)
    W2_taps = jnp.einsum('bB,koc->kboBc', eye_b, W2_full) \
        .reshape(K, Nb * growth, Nb * Cout).astype(conv_dtype)
    shift_big = jnp.tile(shift, Nb).reshape(Nb * Cout, 1)        # fp32

    @jax.jit
    def forward(x):                                              # x: (N, Cin, L)
        N, Cx, L = x.shape
        assert Cx == Cin, (Cx, Cin)
        assert N % Nb == 0, (N, Nb)
        Lp = ((L + 127) // 128) * 128                            # lane-dense tiles
        assert Lp > pad, (Lp, pad)

        x32 = x.astype(f32)
        if Lp != L:
            x32 = jnp.pad(x32, ((0, 0), (0, 0), (0, Lp - L)))
        x2 = x32.reshape(N * Cin, Lp)                            # free reshape (NCL kept)

        kernel = _make_kernel(Nb, Lp, L, Cin, Cout, growth, K, pad, conv_dtype)

        out2 = pl.pallas_call(
            kernel,
            out_shape=jax.ShapeDtypeStruct((N * Ctot, Lp), f32),
            grid=(N // Nb,),
            in_specs=[
                pl.BlockSpec((Nb * Cin, Lp), lambda b: (b, 0)),
                pl.BlockSpec((K, Nb * Cout, Nb * Cin), lambda b: (0, 0, 0)),
                pl.BlockSpec((K, Nb * growth, Nb * Cout), lambda b: (0, 0, 0)),
                pl.BlockSpec((Nb * Cout, 1), lambda b: (0, 0)),
            ],
            out_specs=pl.BlockSpec((Nb * Ctot, Lp), lambda b: (b, 0)),
            compiler_params=pltpu.CompilerParams(
                dimension_semantics=("parallel",)),
        )(x2, W1_taps, W2_taps, shift_big)

        out = out2.reshape(N, Ctot, Lp)
        return out[:, :, :L] if Lp != L else out

    return forward


def reference_forward(x, w1, w2, gamma, beta, mean, var, *, groups, pad, eps=1e-5):
    """Pure-JAX reference matching the PyTorch forward (eval-mode BN, inplace ReLU)."""
    x_relu = jnp.maximum(x, 0.0)           # nn.ReLU(inplace=True) mutates x itself
    y = lax.conv_general_dilated(x_relu, w1, window_strides=(1,), padding=[(pad, pad)],
                                 dimension_numbers=("NCH", "OIH", "NCH"),
                                 feature_group_count=groups,
                                 precision=lax.Precision.HIGHEST)
    y = ((y - mean[None, :, None]) / jnp.sqrt(var[None, :, None] + eps)
         * gamma[None, :, None] + beta[None, :, None])
    y = jnp.maximum(y, 0.0)
    y = lax.conv_general_dilated(y, w2, window_strides=(1,), padding=[(pad, pad)],
                                 dimension_numbers=("NCH", "OIH", "NCH"),
                                 feature_group_count=groups,
                                 precision=lax.Precision.HIGHEST)
    return jnp.concatenate([x_relu, y], axis=1)


if __name__ == "__main__":
    # Shapes consistent with EncoderLayer(i_channel, o_channel, growth_rate, groups, pad2).
    N, L = 16, 128
    i_channel, o_channel, growth_rate, groups, pad2 = 8, 8, 8, 2, 7
    K = 2 * pad2 + 1

    key = jax.random.PRNGKey(0)
    k_x, k_x2, k_w1, k_w2, k_g, k_b, k_m, k_v = jax.random.split(key, 8)

    x = jax.random.normal(k_x, (N, i_channel, L), dtype=jnp.float32)
    w1 = 0.1 * jax.random.normal(k_w1, (o_channel, i_channel // groups, K), jnp.float32)
    w2 = 0.1 * jax.random.normal(k_w2, (growth_rate, o_channel // groups, K), jnp.float32)
    bn_gamma = 1.0 + 0.1 * jax.random.normal(k_g, (o_channel,), jnp.float32)
    bn_beta = 0.1 * jax.random.normal(k_b, (o_channel,), jnp.float32)
    bn_mean = 0.1 * jax.random.normal(k_m, (o_channel,), jnp.float32)
    bn_var = 0.5 + jnp.abs(jax.random.normal(k_v, (o_channel,), jnp.float32))

    # Build once (weight packing hoisted out of the per-call path), reuse for all calls.
    fwd = make_encoder_layer(w1, w2, bn_gamma, bn_beta, bn_mean, bn_var,
                             groups=groups, pad=pad2, batch_block=4)

    # 1) fp32 path, lane-aligned L.
    out = jax.block_until_ready(fwd(x))
    ref = jax.block_until_ready(
        reference_forward(x, w1, w2, bn_gamma, bn_beta, bn_mean, bn_var,
                          groups=groups, pad=pad2))
    assert out.shape == (N, i_channel + growth_rate, L), out.shape
    err = float(jnp.max(jnp.abs(out - ref)))
    assert jnp.allclose(out, ref, atol=1e-3, rtol=1e-3), err

    # 2) fp32 path, non-multiple-of-128 L (exercises lane padding + edge masking).
    L2 = 100
    x_odd = jax.random.normal(k_x2, (N, i_channel, L2), dtype=jnp.float32)
    out2 = jax.block_until_ready(fwd(x_odd))
    ref2 = jax.block_until_ready(
        reference_forward(x_odd, w1, w2, bn_gamma, bn_beta, bn_mean, bn_var,
                          groups=groups, pad=pad2))
    assert out2.shape == (N, i_channel + growth_rate, L2), out2.shape
    err2 = float(jnp.max(jnp.abs(out2 - ref2)))
    assert jnp.allclose(out2, ref2, atol=1e-3, rtol=1e-3), err2

    # 3) bf16 conv path (v6e/v7x MXU-native; halves tap/weight VMEM + DMA).
    #    Looser tolerance: bf16 inputs over a K*Cin-deep accumulation vs fp32 reference.
    fwd_bf16 = make_encoder_layer(w1, w2, bn_gamma, bn_beta, bn_mean, bn_var,
                                  groups=groups, pad=pad2, batch_block=4,
                                  conv_dtype=jnp.bfloat16)
    out3 = jax.block_until_ready(fwd_bf16(x))
    err3 = float(jnp.max(jnp.abs(out3 - ref)))
    assert jnp.allclose(out3, ref, atol=1e-1, rtol=1e-1), err3

    print("KERNEL_OK")
</pallas_src>

<mosaic_0001>
module attributes {stable_mosaic.version = 11 : i64} {
  func.func @kernel(%arg0: i32, %arg1: memref<32x128xf32, #tpu.memory_space<vmem>>, %arg2: memref<15x32x32xf32, #tpu.memory_space<vmem>>, %arg3: memref<15x32x32xf32, #tpu.memory_space<vmem>>, %arg4: memref<32x1xf32, #tpu.memory_space<vmem>>, %arg5: memref<64x128xf32, #tpu.memory_space<vmem>>) attributes {dimension_semantics = [#tpu.dimension_semantics<parallel>], iteration_bounds = array<i64: 4>, scalar_prefetch = 0 : i64, scratch_operands = 0 : i64, tpu.core_type = #tpu.core_type<tc>, window_params = [{transform_indices = @transform_0, window_bounds = array<i64: 32, 128>}, {pipeline_mode = #tpu.pipeline_mode<synchronous>, transform_indices = @transform_1, window_bounds = array<i64: 15, 32, 32>}, {pipeline_mode = #tpu.pipeline_mode<synchronous>, transform_indices = @transform_2, window_bounds = array<i64: 15, 32, 32>}, {pipeline_mode = #tpu.pipeline_mode<synchronous>, transform_indices = @transform_3, window_bounds = array<i64: 32, 1>}, {transform_indices = @transform_4, window_bounds = array<i64: 64, 128>}]} {
    %c0 = arith.constant 0 : index
    %c0_0 = arith.constant 0 : index
    %0 = vector.load %arg1[%c0, %c0_0] : memref<32x128xf32, #tpu.memory_space<vmem>>, vector<32x128xf32>
    %cst = arith.constant 0.000000e+00 : f32
    %1 = vector.broadcast %cst : f32 to vector<32x128xf32>
    %2 = arith.maximumf %0, %1 : vector<32x128xf32>
    %3 = tpu.iota {dimensions = array<i32: 1>} : vector<1x128xi32>
    %c7_i32 = arith.constant 7 : i32
    %4 = tpu.dynamic_rotate %2 by %c7_i32 dim 1 : vector<32x128xf32>, i32 -> vector<32x128xf32>
    %c7_i32_1 = arith.constant 7 : i32
    %5 = vector.broadcast %c7_i32_1 : i32 to vector<1x128xi32>
    %6 = arith.cmpi sge, %3, %5 : vector<1x128xi32>
    %cst_2 = arith.constant 0.000000e+00 : f32
    %7 = vector.broadcast %cst_2 : f32 to vector<32x128xf32>
    %8 = vector.shape_cast %6 : vector<1x128xi1> to vector<1x128xi1>
    %9 = vector.broadcast %8 : vector<1x128xi1> to vector<32x128xi1>
    %10 = arith.select %9, %4, %7 : vector<32x128xi1>, vector<32x128xf32>
    %c0_3 = arith.constant 0 : index
    %c0_4 = arith.constant 0 : index
    %c0_5 = arith.constant 0 : index
    %11 = vector.load %arg2[%c0_3, %c0_4, %c0_5] : memref<15x32x32xf32, #tpu.memory_space<vmem>>, vector<1x32x32xf32>
    %12 = vector.shape_cast %11 : vector<1x32x32xf32> to vector<32x32xf32>
    %cst_6 = arith.constant dense<0.000000e+00> : vector<32x128xf32>
    %13 = tpu.matmul %12, %10, %cst_6 {dimension_numbers = #tpu.dot_dimension_numbers<[1], [0], [0], [1], [0, 0, 1, 1], [], []>} : vector<32x32xf32>, vector<32x128xf32>, vector<32x128xf32> -> vector<32x128xf32>
    %c6_i32 = arith.constant 6 : i32
    %14 = tpu.dynamic_rotate %2 by %c6_i32 dim 1 : vector<32x128xf32>, i32 -> vector<32x128xf32>
    %c6_i32_7 = arith.constant 6 : i32
    %15 = vector.broadcast %c6_i32_7 : i32 to vector<1x128xi32>
    %16 = arith.cmpi sge, %3, %15 : vector<1x128xi32>
    %cst_8 = arith.constant 0.000000e+00 : f32
    %17 = vector.broadcast %cst_8 : f32 to vector<32x128xf32>
    %18 = vector.shape_cast %16 : vector<1x128xi1> to vector<1x128xi1>
    %19 = vector.broadcast %18 : vector<1x128xi1> to vector<32x128xi1>
    %20 = arith.select %19, %14, %17 : vector<32x128xi1>, vector<32x128xf32>
    %c1 = arith.constant 1 : index
    %c0_9 = arith.constant 0 : index
    %c0_10 = arith.constant 0 : index
    %21 = vector.load %arg2[%c1, %c0_9, %c0_10] : memref<15x32x32xf32, #tpu.memory_space<vmem>>, vector<1x32x32xf32>
    %22 = vector.shape_cast %21 : vector<1x32x32xf32> to vector<32x32xf32>
    %cst_11 = arith.constant dense<0.000000e+00> : vector<32x128xf32>
    %23 = tpu.matmul %22, %20, %cst_11 {dimension_numbers = #tpu.dot_dimension_numbers<[1], [0], [0], [1], [0, 0, 1, 1], [], []>} : vector<32x32xf32>, vector<32x128xf32>, vector<32x128xf32> -> vector<32x128xf32>
    %24 = arith.addf %13, %23 : vector<32x128xf32>
    %c5_i32 = arith.constant 5 : i32
    %25 = tpu.dynamic_rotate %2 by %c5_i32 dim 1 : vector<32x128xf32>, i32 -> vector<32x128xf32>
    %c5_i32_12 = arith.constant 5 : i32
    %26 = vector.broadcast %c5_i32_12 : i32 to vector<1x128xi32>
    %27 = arith.cmpi sge, %3, %26 : vector<1x128xi32>
    %cst_13 = arith.constant 0.000000e+00 : f32
    %28 = vector.broadcast %cst_13 : f32 to vector<32x128xf32>
    %29 = vector.shape_cast %27 : vector<1x128xi1> to vector<1x128xi1>
    %30 = vector.broadcast %29 : vector<1x128xi1> to vector<32x128xi1>
    %31 = arith.select %30, %25, %28 : vector<32x128xi1>, vector<32x128xf32>
    %c2 = arith.constant 2 : index
    %c0_14 = arith.constant 0 : index
    %c0_15 = arith.constant 0 : index
    %32 = vector.load %arg2[%c2, %c0_14, %c0_15] : memref<15x32x32xf32, #tpu.memory_space<vmem>>, vector<1x32x32xf32>
    %33 = vector.shape_cast %32 : vector<1x32x32xf32> to vector<32x32xf32>
    %cst_16 = arith.constant dense<0.000000e+00> : vector<32x128xf32>
    %34 = tpu.matmul %33, %31, %cst_16 {dimension_numbers = #tpu.dot_dimension_numbers<[1], [0], [0], [1], [0, 0, 1, 1], [], []>} : vector<32x32xf32>, vector<32x128xf32>, vector<32x128xf32> -> vector<32x128xf32>
    %35 = arith.addf %24, %34 : vector<32x128xf32>
    %c4_i32 = arith.constant 4 : i32
    %36 = tpu.dynamic_rotate %2 by %c4_i32 dim 1 : vector<32x128xf32>, i32 -> vector<32x128xf32>
    %c4_i32_17 = arith.constant 4 : i32
    %37 = vector.broadcast %c4_i32_17 : i32 to vector<1x128xi32>
    %38 = arith.cmpi sge, %3, %37 : vector<1x128xi32>
    %cst_18 = arith.constant 0.000000e+00 : f32
    %39 = vector.broadcast %cst_18 : f32 to vector<32x128xf32>
    %40 = vector.shape_cast %38 : vector<1x128xi1> to vector<1x128xi1>
    %41 = vector.broadcast %40 : vector<1x128xi1> to vector<32x128xi1>
    %42 = arith.select %41, %36, %39 : vector<32x128xi1>, vector<32x128xf32>
    %c3 = arith.constant 3 : index
    %c0_19 = arith.constant 0 : index
    %c0_20 = arith.constant 0 : index
    %43 = vector.load %arg2[%c3, %c0_19, %c0_20] : memref<15x32x32xf32, #tpu.memory_space<vmem>>, vector<1x32x32xf32>
    %44 = vector.shape_cast %43 : vector<1x32x32xf32> to vector<32x32xf32>
    %cst_21 = arith.constant dense<0.000000e+00> : vector<32x128xf32>
    %45 = tpu.matmul %44, %42, %cst_21 {dimension_numbers = #tpu.dot_dimension_numbers<[1], [0], [0], [1], [0, 0, 1, 1], [], []>} : vector<32x32xf32>, vector<32x128xf32>, vector<32x128xf32> -> vector<32x128xf32>
    %46 = arith.addf %35, %45 : vector<32x128xf32>
    %c3_i32 = arith.constant 3 : i32
    %47 = tpu.dynamic_rotate %2 by %c3_i32 dim 1 : vector<32x128xf32>, i32 -> vector<32x128xf32>
    %c3_i32_22 = arith.constant 3 : i32
    %48 = vector.broadcast %c3_i32_22 : i32 to vector<1x128xi32>
    %49 = arith.cmpi sge, %3, %48 : vector<1x128xi32>
    %cst_23 = arith.constant 0.000000e+00 : f32
    %50 = vector.broadcast %cst_23 : f32 to vector<32x128xf32>
    %51 = vector.shape_cast %49 : vector<1x128xi1> to vector<1x128xi1>
    %52 = vector.broadcast %51 : vector<1x128xi1> to vector<32x128xi1>
    %53 = arith.select %52, %47, %50 : vector<32x128xi1>, vector<32x128xf32>
    %c4 = arith.constant 4 : index
    %c0_24 = arith.constant 0 : index
    %c0_25 = arith.constant 0 : index
    %54 = vector.load %arg2[%c4, %c0_24, %c0_25] : memref<15x32x32xf32, #tpu.memory_space<vmem>>, vector<1x32x32xf32>
    %55 = vector.shape_cast %54 : vector<1x32x32xf32> to vector<32x32xf32>
    %cst_26 = arith.constant dense<0.000000e+00> : vector<32x128xf32>
    %56 = tpu.matmul %55, %53, %cst_26 {dimension_numbers = #tpu.dot_dimension_numbers<[1], [0], [0], [1], [0, 0, 1, 1], [], []>} : vector<32x32xf32>, vector<32x128xf32>, vector<32x128xf32> -> vector<32x128xf32>
    %57 = arith.addf %46, %56 : vector<32x128xf32>
    %c2_i32 = arith.constant 2 : i32
    %58 = tpu.dynamic_rotate %2 by %c2_i32 dim 1 : vector<32x128xf32>, i32 -> vector<32x128xf32>
    %c2_i32_27 = arith.constant 2 : i32
    %59 = vector.broadcast %c2_i32_27 : i32 to vector<1x128xi32>
    %60 = arith.cmpi sge, %3, %59 : vector<1x128xi32>
    %cst_28 = arith.constant 0.000000e+00 : f32
    %61 = vector.broadcast %cst_28 : f32 to vector<32x128xf32>
    %62 = vector.shape_cast %60 : vector<1x128xi1> to vector<1x128xi1>
    %63 = vector.broadcast %62 : vector<1x128xi1> to vector<32x128xi1>
    %64 = arith.select %63, %58, %61 : vector<32x128xi1>, vector<32x128xf32>
    %c5 = arith.constant 5 : index
    %c0_29 = arith.constant 0 : index
    %c0_30 = arith.constant 0 : index
    %65 = vector.load %arg2[%c5, %c0_29, %c0_30] : memref<15x32x32xf32, #tpu.memory_space<vmem>>, vector<1x32x32xf32>
    %66 = vector.shape_cast %65 : vector<1x32x32xf32> to vector<32x32xf32>
    %cst_31 = arith.constant dense<0.000000e+00> : vector<32x128xf32>
    %67 = tpu.matmul %66, %64, %cst_31 {dimension_numbers = #tpu.dot_dimension_numbers<[1], [0], [0], [1], [0, 0, 1, 1], [], []>} : vector<32x32xf32>, vector<32x128xf32>, vector<32x128xf32> -> vector<32x128xf32>
    %68 = arith.addf %57, %67 : vector<32x128xf32>
    %c1_i32 = arith.constant 1 : i32
    %69 = tpu.dynamic_rotate %2 by %c1_i32 dim 1 : vector<32x128xf32>, i32 -> vector<32x128xf32>
    %c1_i32_32 = arith.constant 1 : i32
    %70 = vector.broadcast %c1_i32_32 : i32 to vector<1x128xi32>
    %71 = arith.cmpi sge, %3, %70 : vector<1x128xi32>
    %cst_33 = arith.constant 0.000000e+00 : f32
    %72 = vector.broadcast %cst_33 : f32 to vector<32x128xf32>
    %73 = vector.shape_cast %71 : vector<1x128xi1> to vector<1x128xi1>
    %74 = vector.broadcast %73 : vector<1x128xi1> to vector<32x128xi1>
    %75 = arith.select %74, %69, %72 : vector<32x128xi1>, vector<32x128xf32>
    %c6 = arith.constant 6 : index
    %c0_34 = arith.constant 0 : index
    %c0_35 = arith.constant 0 : index
    %76 = vector.load %arg2[%c6, %c0_34, %c0_35] : memref<15x32x32xf32, #tpu.memory_space<vmem>>, vector<1x32x32xf32>
    %77 = vector.shape_cast %76 : vector<1x32x32xf32> to vector<32x32xf32>
    %cst_36 = arith.constant dense<0.000000e+00> : vector<32x128xf32>
    %78 = tpu.matmul %77, %75, %cst_36 {dimension_numbers = #tpu.dot_dimension_numbers<[1], [0], [0], [1], [0, 0, 1, 1], [], []>} : vector<32x32xf32>, vector<32x128xf32>, vector<32x128xf32> -> vector<32x128xf32>
    %79 = arith.addf %68, %78 : vector<32x128xf32>
    %c7 = arith.constant 7 : index
    %c0_37 = arith.constant 0 : index
    %c0_38 = arith.constant 0 : index
    %80 = vector.load %arg2[%c7, %c0_37, %c0_38] : memref<15x32x32xf32, #tpu.memory_space<vmem>>, vector<1x32x32xf32>
    %81 = vector.shape_cast %80 : vector<1x32x32xf32> to vector<32x32xf32>
    %cst_39 = arith.constant dense<0.000000e+00> : vector<32x128xf32>
    %82 = tpu.matmul %81, %2, %cst_39 {dimension_numbers = #tpu.dot_dimension_numbers<[1], [0], [0], [1], [0, 0, 1, 1], [], []>} : vector<32x32xf32>, vector<32x128xf32>, vector<32x128xf32> -> vector<32x128xf32>
    %83 = arith.addf %79, %82 : vector<32x128xf32>
    %c127_i32 = arith.constant 127 : i32
    %84 = tpu.dynamic_rotate %2 by %c127_i32 dim 1 : vector<32x128xf32>, i32 -> vector<32x128xf32>
    %c127_i32_40 = arith.constant 127 : i32
    %85 = vector.broadcast %c127_i32_40 : i32 to vector<1x128xi32>
    %86 = arith.cmpi slt, %3, %85 : vector<1x128xi32>
    %cst_41 = arith.constant 0.000000e+00 : f32
    %87 = vector.broadcast %cst_41 : f32 to vector<32x128xf32>
    %88 = vector.shape_cast %86 : vector<1x128xi1> to vector<1x128xi1>
    %89 = vector.broadcast %88 : vector<1x128xi1> to vector<32x128xi1>
    %90 = arith.select %89, %84, %87 : vector<32x128xi1>, vector<32x128xf32>
    %c8 = arith.constant 8 : index
    %c0_42 = arith.constant 0 : index
    %c0_43 = arith.constant 0 : index
    %91 = vector.load %arg2[%c8, %c0_42, %c0_43] : memref<15x32x32xf32, #tpu.memory_space<vmem>>, vector<1x32x32xf32>
    %92 = vector.shape_cast %91 : vector<1x32x32xf32> to vector<32x32xf32>
    %cst_44 = arith.constant dense<0.000000e+00> : vector<32x128xf32>
    %93 = tpu.matmul %92, %90, %cst_44 {dimension_numbers = #tpu.dot_dimension_numbers<[1], [0], [0], [1], [0, 0, 1, 1], [], []>} : vector<32x32xf32>, vector<32x128xf32>, vector<32x128xf32> -> vector<32x128xf32>
    %94 = arith.addf %83, %93 : vector<32x128xf32>
    %c126_i32 = arith.constant 126 : i32
    %95 = tpu.dynamic_rotate %2 by %c126_i32 dim 1 : vector<32x128xf32>, i32 -> vector<32x128xf32>
    %c126_i32_45 = arith.constant 126 : i32
    %96 = vector.broadcast %c126_i32_45 : i32 to vector<1x128xi32>
    %97 = arith.cmpi slt, %3, %96 : vector<1x128xi32>
    %cst_46 = arith.constant 0.000000e+00 : f32
    %98 = vector.broadcast %cst_46 : f32 to vector<32x128xf32>
    %99 = vector.shape_cast %97 : vector<1x128xi1> to vector<1x128xi1>
    %100 = vector.broadcast %99 : vector<1x128xi1> to vector<32x128xi1>
    %101 = arith.select %100, %95, %98 : vector<32x128xi1>, vector<32x128xf32>
    %c9 = arith.constant 9 : index
    %c0_47 = arith.constant 0 : index
    %c0_48 = arith.constant 0 : index
    %102 = vector.load %arg2[%c9, %c0_47, %c0_48] : memref<15x32x32xf32, #tpu.memory_space<vmem>>, vector<1x32x32xf32>
    %103 = vector.shape_cast %102 : vector<1x32x32xf32> to vector<32x32xf32>
    %cst_49 = arith.constant dense<0.000000e+00> : vector<32x128xf32>
    %104 = tpu.matmul %103, %101, %cst_49 {dimension_numbers = #tpu.dot_dimension_numbers<[1], [0], [0], [1], [0, 0, 1, 1], [], []>} : vector<32x32xf32>, vector<32x128xf32>, vector<32x128xf32> -> vector<32x128xf32>
    %105 = arith.addf %94, %104 : vector<32x128xf32>
    %c125_i32 = arith.constant 125 : i32
    %106 = tpu.dynamic_rotate %2 by %c125_i32 dim 1 : vector<32x128xf32>, i32 -> vector<32x128xf32>
    %c125_i32_50 = arith.constant 125 : i32
    %107 = vector.broadcast %c125_i32_50 : i32 to vector<1x128xi32>
    %108 = arith.cmpi slt, %3, %107 : vector<1x128xi32>
    %cst_51 = arith.constant 0.000000e+00 : f32
    %109 = vector.broadcast %cst_51 : f32 to vector<32x128xf32>
    %110 = vector.shape_cast %108 : vector<1x128xi1> to vector<1x128xi1>
    %111 = vector.broadcast %110 : vector<1x128xi1> to vector<32x128xi1>
    %112 = arith.select %111, %106, %109 : vector<32x128xi1>, vector<32x128xf32>
    %c10 = arith.constant 10 : index
    %c0_52 = arith.constant 0 : index
    %c0_53 = arith.constant 0 : index
    %113 = vector.load %arg2[%c10, %c0_52, %c0_53] : memref<15x32x32xf32, #tpu.memory_space<vmem>>, vector<1x32x32xf32>
    %114 = vector.shape_cast %113 : vector<1x32x32xf32> to vector<32x32xf32>
    %cst_54 = arith.constant dense<0.000000e+00> : vector<32x128xf32>
    %115 = tpu.matmul %114, %112, %cst_54 {dimension_numbers = #tpu.dot_dimension_numbers<[1], [0], [0], [1], [0, 0, 1, 1], [], []>} : vector<32x32xf32>, vector<32x128xf32>, vector<32x128xf32> -> vector<32x128xf32>
    %116 = arith.addf %105, %115 : vector<32x128xf32>
    %c124_i32 = arith.constant 124 : i32
    %117 = tpu.dynamic_rotate %2 by %c124_i32 dim 1 : vector<32x128xf32>, i32 -> vector<32x128xf32>
    %c124_i32_55 = arith.constant 124 : i32
    %118 = vector.broadcast %c124_i32_55 : i32 to vector<1x128xi32>
    %119 = arith.cmpi slt, %3, %118 : vector<1x128xi32>
    %cst_56 = arith.constant 0.000000e+00 : f32
    %120 = vector.broadcast %cst_56 : f32 to vector<32x128xf32>
    %121 = vector.shape_cast %119 : vector<1x128xi1> to vector<1x128xi1>
    %122 = vector.broadcast %121 : vector<1x128xi1> to vector<32x128xi1>
    %123 = arith.select %122, %117, %120 : vector<32x128xi1>, vector<32x128xf32>
    %c11 = arith.constant 11 : index
    %c0_57 = arith.constant 0 : index
    %c0_58 = arith.constant 0 : index
    %124 = vector.load %arg2[%c11, %c0_57, %c0_58] : memref<15x32x32xf32, #tpu.memory_space<vmem>>, vector<1x32x32xf32>
    %125 = vector.shape_cast %124 : vector<1x32x32xf32> to vector<32x32xf32>
    %cst_59 = arith.constant dense<0.000000e+00> : vector<32x128xf32>
    %126 = tpu.matmul %125, %123, %cst_59 {dimension_numbers = #tpu.dot_dimension_numbers<[1], [0], [0], [1], [0, 0, 1, 1], [], []>} : vector<32x32xf32>, vector<32x128xf32>, vector<32x128xf32> -> vector<32x128xf32>
    %127 = arith.addf %116, %126 : vector<32x128xf32>
    %c123_i32 = arith.constant 123 : i32
    %128 = tpu.dynamic_rotate %2 by %c123_i32 dim 1 : vector<32x128xf32>, i32 -> vector<32x128xf32>
    %c123_i32_60 = arith.constant 123 : i32
    %129 = vector.broadcast %c123_i32_60 : i32 to vector<1x128xi32>
    %130 = arith.cmpi slt, %3, %129 : vector<1x128xi32>
    %cst_61 = arith.constant 0.000000e+00 : f32
    %131 = vector.broadcast %cst_61 : f32 to vector<32x128xf32>
    %132 = vector.shape_cast %130 : vector<1x128xi1> to vector<1x128xi1>
    %133 = vector.broadcast %132 : vector<1x128xi1> to vector<32x128xi1>
    %134 = arith.select %133, %128, %131 : vector<32x128xi1>, vector<32x128xf32>
    %c12 = arith.constant 12 : index
    %c0_62 = arith.constant 0 : index
    %c0_63 = arith.constant 0 : index
    %135 = vector.load %arg2[%c12, %c0_62, %c0_63] : memref<15x32x32xf32, #tpu.memory_space<vmem>>, vector<1x32x32xf32>
    %136 = vector.shape_cast %135 : vector<1x32x32xf32> to vector<32x32xf32>
    %cst_64 = arith.constant dense<0.000000e+00> : vector<32x128xf32>
    %137 = tpu.matmul %136, %134, %cst_64 {dimension_numbers = #tpu.dot_dimension_numbers<[1], [0], [0], [1], [0, 0, 1, 1], [], []>} : vector<32x32xf32>, vector<32x128xf32>, vector<32x128xf32> -> vector<32x128xf32>
    %138 = arith.addf %127, %137 : vector<32x128xf32>
    %c122_i32 = arith.constant 122 : i32
    %139 = tpu.dynamic_rotate %2 by %c122_i32 dim 1 : vector<32x128xf32>, i32 -> vector<32x128xf32>
    %c122_i32_65 = arith.constant 122 : i32
    %140 = vector.broadcast %c122_i32_65 : i32 to vector<1x128xi32>
    %141 = arith.cmpi slt, %3, %140 : vector<1x128xi32>
    %cst_66 = arith.constant 0.000000e+00 : f32
    %142 = vector.broadcast %cst_66 : f32 to vector<32x128xf32>
    %143 = vector.shape_cast %141 : vector<1x128xi1> to vector<1x128xi1>
    %144 = vector.broadcast %143 : vector<1x128xi1> to vector<32x128xi1>
    %145 = arith.select %144, %139, %142 : vector<32x128xi1>, vector<32x128xf32>
    %c13 = arith.constant 13 : index
    %c0_67 = arith.constant 0 : index
    %c0_68 = arith.constant 0 : index
    %146 = vector.load %arg2[%c13, %c0_67, %c0_68] : memref<15x32x32xf32, #tpu.memory_space<vmem>>, vector<1x32x32xf32>
    %147 = vector.shape_cast %146 : vector<1x32x32xf32> to vector<32x32xf32>
    %cst_69 = arith.constant dense<0.000000e+00> : vector<32x128xf32>
    %148 = tpu.matmul %147, %145, %cst_69 {dimension_numbers = #tpu.dot_dimension_numbers<[1], [0], [0], [1], [0, 0, 1, 1], [], []>} : vector<32x32xf32>, vector<32x128xf32>, vector<32x128xf32> -> vector<32x128xf32>
    %149 = arith.addf %138, %148 : vector<32x128xf32>
    %c121_i32 = arith.constant 121 : i32
    %150 = tpu.dynamic_rotate %2 by %c121_i32 dim 1 : vector<32x128xf32>, i32 -> vector<32x128xf32>
    %c121_i32_70 = arith.constant 121 : i32
    %151 = vector.broadcast %c121_i32_70 : i32 to vector<1x128xi32>
    %152 = arith.cmpi slt, %3, %151 : vector<1x128xi32>
    %cst_71 = arith.constant 0.000000e+00 : f32
    %153 = vector.broadcast %cst_71 : f32 to vector<32x128xf32>
    %154 = vector.shape_cast %152 : vector<1x128xi1> to vector<1x128xi1>
    %155 = vector.broadcast %154 : vector<1x128xi1> to vector<32x128xi1>
    %156 = arith.select %155, %150, %153 : vector<32x128xi1>, vector<32x128xf32>
    %c14 = arith.constant 14 : index
    %c0_72 = arith.constant 0 : index
    %c0_73 = arith.constant 0 : index
    %157 = vector.load %arg2[%c14, %c0_72, %c0_73] : memref<15x32x32xf32, #tpu.memory_space<vmem>>, vector<1x32x32xf32>
    %158 = vector.shape_cast %157 : vector<1x32x32xf32> to vector<32x32xf32>
    %cst_74 = arith.constant dense<0.000000e+00> : vector<32x128xf32>
    %159 = tpu.matmul %158, %156, %cst_74 {dimension_numbers = #tpu.dot_dimension_numbers<[1], [0], [0], [1], [0, 0, 1, 1], [], []>} : vector<32x32xf32>, vector<32x128xf32>, vector<32x128xf32> -> vector<32x128xf32>
    %160 = arith.addf %149, %159 : vector<32x128xf32>
    %c0_75 = arith.constant 0 : index
    %c0_76 = arith.constant 0 : index
    %161 = vector.load %arg4[%c0_75, %c0_76] : memref<32x1xf32, #tpu.memory_space<vmem>>, vector<32x1xf32>
    %162 = vector.broadcast %161 : vector<32x1xf32> to vector<32x128xf32>
    %163 = arith.addf %160, %162 : vector<32x128xf32>
    %cst_77 = arith.constant 0.000000e+00 : f32
    %164 = vector.broadcast %cst_77 : f32 to vector<32x128xf32>
    %165 = arith.maximumf %163, %164 : vector<32x128xf32>
    %c7_i32_78 = arith.constant 7 : i32
    %166 = tpu.dynamic_rotate %165 by %c7_i32_78 dim 1 : vector<32x128xf32>, i32 -> vector<32x128xf32>
    %c7_i32_79 = arith.constant 7 : i32
    %167 = vector.broadcast %c7_i32_79 : i32 to vector<1x128xi32>
    %168 = arith.cmpi sge, %3, %167 : vector<1x128xi32>
    %cst_80 = arith.constant 0.000000e+00 : f32
    %169 = vector.broadcast %cst_80 : f32 to vector<32x128xf32>
    %170 = vector.shape_cast %168 : vector<1x128xi1> to vector<1x128xi1>
    %171 = vector.broadcast %170 : vector<1x128xi1> to vector<32x128xi1>
    %172 = arith.select %171, %166, %169 : vector<32x128xi1>, vector<32x128xf32>
    %c0_81 = arith.constant 0 : index
    %c0_82 = arith.constant 0 : index
    %c0_83 = arith.constant 0 : index
    %173 = vector.load %arg3[%c0_81, %c0_82, %c0_83] : memref<15x32x32xf32, #tpu.memory_space<vmem>>, vector<1x32x32xf32>
    %174 = vector.shape_cast %173 : vector<1x32x32xf32> to vector<32x32xf32>
    %cst_84 = arith.constant dense<0.000000e+00> : vector<32x128xf32>
    %175 = tpu.matmul %174, %172, %cst_84 {dimension_numbers = #tpu.dot_dimension_numbers<[1], [0], [0], [1], [0, 0, 1, 1], [], []>} : vector<32x32xf32>, vector<32x128xf32>, vector<32x128xf32> -> vector<32x128xf32>
    %c6_i32_85 = arith.constant 6 : i32
    %176 = tpu.dynamic_rotate %165 by %c6_i32_85 dim 1 : vector<32x128xf32>, i32 -> vector<32x128xf32>
    %c6_i32_86 = arith.constant 6 : i32
    %177 = vector.broadcast %c6_i32_86 : i32 to vector<1x128xi32>
    %178 = arith.cmpi sge, %3, %177 : vector<1x128xi32>
    %cst_87 = arith.constant 0.000000e+00 : f32
    %179 = vector.broadcast %cst_87 : f32 to vector<32x128xf32>
    %180 = vector.shape_cast %178 : vector<1x128xi1> to vector<1x128xi1>
    %181 = vector.broadcast %180 : vector<1x128xi1> to vector<32x128xi1>
    %182 = arith.select %181, %176, %179 : vector<32x128xi1>, vector<32x128xf32>
    %c1_88 = arith.constant 1 : index
    %c0_89 = arith.constant 0 : index
    %c0_90 = arith.constant 0 : index
    %183 = vector.load %arg3[%c1_88, %c0_89, %c0_90] : memref<15x32x32xf32, #tpu.memory_space<vmem>>, vector<1x32x32xf32>
    %184 = vector.shape_cast %183 : vector<1x32x32xf32> to vector<32x32xf32>
    %cst_91 = arith.constant dense<0.000000e+00> : vector<32x128xf32>
    %185 = tpu.matmul %184, %182, %cst_91 {dimension_numbers = #tpu.dot_dimension_numbers<[1], [0], [0], [1], [0, 0, 1, 1], [], []>} : vector<32x32xf32>, vector<32x128xf32>, vector<32x128xf32> -> vector<32x128xf32>
    %186 = arith.addf %175, %185 : vector<32x128xf32>
    %c5_i32_92 = arith.constant 5 : i32
    %187 = tpu.dynamic_rotate %165 by %c5_i32_92 dim 1 : vector<32x128xf32>, i32 -> vector<32x128xf32>
    %c5_i32_93 = arith.constant 5 : i32
    %188 = vector.broadcast %c5_i32_93 : i32 to vector<1x128xi32>
    %189 = arith.cmpi sge, %3, %188 : vector<1x128xi32>
    %cst_94 = arith.constant 0.000000e+00 : f32
    %190 = vector.broadcast %cst_94 : f32 to vector<32x128xf32>
    %191 = vector.shape_cast %189 : vector<1x128xi1> to vector<1x128xi1>
    %192 = vector.broadcast %191 : vector<1x128xi1> to vector<32x128xi1>
    %193 = arith.select %192, %187, %190 : vector<32x128xi1>, vector<32x128xf32>
    %c2_95 = arith.constant 2 : index
    %c0_96 = arith.constant 0 : index
    %c0_97 = arith.constant 0 : index
    %194 = vector.load %arg3[%c2_95, %c0_96, %c0_97] : memref<15x32x32xf32, #tpu.memory_space<vmem>>, vector<1x32x32xf32>
    %195 = vector.shape_cast %194 : vector<1x32x32xf32> to vector<32x32xf32>
    %cst_98 = arith.constant dense<0.000000e+00> : vector<32x128xf32>
    %196 = tpu.matmul %195, %193, %cst_98 {dimension_numbers = #tpu.dot_dimension_numbers<[1], [0], [0], [1], [0, 0, 1, 1], [], []>} : vector<32x32xf32>, vector<32x128xf32>, vector<32x128xf32> -> vector<32x128xf32>
    %197 = arith.addf %186, %196 : vector<32x128xf32>
    %c4_i32_99 = arith.constant 4 : i32
    %198 = tpu.dynamic_rotate %165 by %c4_i32_99 dim 1 : vector<32x128xf32>, i32 -> vector<32x128xf32>
    %c4_i32_100 = arith.constant 4 : i32
    %199 = vector.broadcast %c4_i32_100 : i32 to vector<1x128xi32>
    %200 = arith.cmpi sge, %3, %199 : vector<1x128xi32>
    %cst_101 = arith.constant 0.000000e+00 : f32
    %201 = vector.broadcast %cst_101 : f32 to vector<32x128xf32>
    %202 = vector.shape_cast %200 : vector<1x128xi1> to vector<1x128xi1>
    %203 = vector.broadcast %202 : vector<1x128xi1> to vector<32x128xi1>
    %204 = arith.select %203, %198, %201 : vector<32x128xi1>, vector<32x128xf32>
    %c3_102 = arith.constant 3 : index
    %c0_103 = arith.constant 0 : index
    %c0_104 = arith.constant 0 : index
    %205 = vector.load %arg3[%c3_102, %c0_103, %c0_104] : memref<15x32x32xf32, #tpu.memory_space<vmem>>, vector<1x32x32xf32>
    %206 = vector.shape_cast %205 : vector<1x32x32xf32> to vector<32x32xf32>
    %cst_105 = arith.constant dense<0.000000e+00> : vector<32x128xf32>
    %207 = tpu.matmul %206, %204, %cst_105 {dimension_numbers = #tpu.dot_dimension_numbers<[1], [0], [0], [1], [0, 0, 1, 1], [], []>} : vector<32x32xf32>, vector<32x128xf32>, vector<32x128xf32> -> vector<32x128xf32>
    %208 = arith.addf %197, %207 : vector<32x128xf32>
    %c3_i32_106 = arith.constant 3 : i32
    %209 = tpu.dynamic_rotate %165 by %c3_i32_106 dim 1 : vector<32x128xf32>, i32 -> vector<32x128xf32>
    %c3_i32_107 = arith.constant 3 : i32
    %210 = vector.broadcast %c3_i32_107 : i32 to vector<1x128xi32>
    %211 = arith.cmpi sge, %3, %210 : vector<1x128xi32>
    %cst_108 = arith.constant 0.000000e+00 : f32
    %212 = vector.broadcast %cst_108 : f32 to vector<32x128xf32>
    %213 = vector.shape_cast %211 : vector<1x128xi1> to vector<1x128xi1>
    %214 = vector.broadcast %213 : vector<1x128xi1> to vector<32x128xi1>
    %215 = arith.select %214, %209, %212 : vector<32x128xi1>, vector<32x128xf32>
    %c4_109 = arith.constant 4 : index
    %c0_110 = arith.constant 0 : index
    %c0_111 = arith.constant 0 : index
    %216 = vector.load %arg3[%c4_109, %c0_110, %c0_111] : memref<15x32x32xf32, #tpu.memory_space<vmem>>, vector<1x32x32xf32>
    %217 = vector.shape_cast %216 : vector<1x32x32xf32> to vector<32x32xf32>
    %cst_112 = arith.constant dense<0.000000e+00> : vector<32x128xf32>
    %218 = tpu.matmul %217, %215, %cst_112 {dimension_numbers = #tpu.dot_dimension_numbers<[1], [0], [0], [1], [0, 0, 1, 1], [], []>} : vector<32x32xf32>, vector<32x128xf32>, vector<32x128xf32> -> vector<32x128xf32>
    %219 = arith.addf %208, %218 : vector<32x128xf32>
    %c2_i32_113 = arith.constant 2 : i32
    %220 = tpu.dynamic_rotate %165 by %c2_i32_113 dim 1 : vector<32x128xf32>, i32 -> vector<32x128xf32>
    %c2_i32_114 = arith.constant 2 : i32
    %221 = vector.broadcast %c2_i32_114 : i32 to vector<1x128xi32>
    %222 = arith.cmpi sge, %3, %221 : vector<1x128xi32>
    %cst_115 = arith.constant 0.000000e+00 : f32
    %223 = vector.broadcast %cst_115 : f32 to vector<32x128xf32>
    %224 = vector.shape_cast %222 : vector<1x128xi1> to vector<1x128xi1>
    %225 = vector.broadcast %224 : vector<1x128xi1> to vector<32x128xi1>
    %226 = arith.select %225, %220, %223 : vector<32x128xi1>, vector<32x128xf32>
    %c5_116 = arith.constant 5 : index
    %c0_117 = arith.constant 0 : index
    %c0_118 = arith.constant 0 : index
    %227 = vector.load %arg3[%c5_116, %c0_117, %c0_118] : memref<15x32x32xf32, #tpu.memory_space<vmem>>, vector<1x32x32xf32>
    %228 = vector.shape_cast %227 : vector<1x32x32xf32> to vector<32x32xf32>
    %cst_119 = arith.constant dense<0.000000e+00> : vector<32x128xf32>
    %229 = tpu.matmul %228, %226, %cst_119 {dimension_numbers = #tpu.dot_dimension_numbers<[1], [0], [0], [1], [0, 0, 1, 1], [], []>} : vector<32x32xf32>, vector<32x128xf32>, vector<32x128xf32> -> vector<32x128xf32>
    %230 = arith.addf %219, %229 : vector<32x128xf32>
    %c1_i32_120 = arith.constant 1 : i32
    %231 = tpu.dynamic_rotate %165 by %c1_i32_120 dim 1 : vector<32x128xf32>, i32 -> vector<32x128xf32>
    %c1_i32_121 = arith.constant 1 : i32
    %232 = vector.broadcast %c1_i32_121 : i32 to vector<1x128xi32>
    %233 = arith.cmpi sge, %3, %232 : vector<1x128xi32>
    %cst_122 = arith.constant 0.000000e+00 : f32
    %234 = vector.broadcast %cst_122 : f32 to vector<32x128xf32>
    %235 = vector.shape_cast %233 : vector<1x128xi1> to vector<1x128xi1>
    %236 = vector.broadcast %235 : vector<1x128xi1> to vector<32x128xi1>
    %237 = arith.select %236, %231, %234 : vector<32x128xi1>, vector<32x128xf32>
    %c6_123 = arith.constant 6 : index
    %c0_124 = arith.constant 0 : index
    %c0_125 = arith.constant 0 : index
    %238 = vector.load %arg3[%c6_123, %c0_124, %c0_125] : memref<15x32x32xf32, #tpu.memory_space<vmem>>, vector<1x32x32xf32>
    %239 = vector.shape_cast %238 : vector<1x32x32xf32> to vector<32x32xf32>
    %cst_126 = arith.constant dense<0.000000e+00> : vector<32x128xf32>
    %240 = tpu.matmul %239, %237, %cst_126 {dimension_numbers = #tpu.dot_dimension_numbers<[1], [0], [0], [1], [0, 0, 1, 1], [], []>} : vector<32x32xf32>, vector<32x128xf32>, vector<32x128xf32> -> vector<32x128xf32>
    %241 = arith.addf %230, %240 : vector<32x128xf32>
    %c7_127 = arith.constant 7 : index
    %c0_128 = arith.constant 0 : index
    %c0_129 = arith.constant 0 : index
    %242 = vector.load %arg3[%c7_127, %c0_128, %c0_129] : memref<15x32x32xf32, #tpu.memory_space<vmem>>, vector<1x32x32xf32>
    %243 = vector.shape_cast %242 : vector<1x32x32xf32> to vector<32x32xf32>
    %cst_130 = arith.constant dense<0.000000e+00> : vector<32x128xf32>
    %244 = tpu.matmul %243, %165, %cst_130 {dimension_numbers = #tpu.dot_dimension_numbers<[1], [0], [0], [1], [0, 0, 1, 1], [], []>} : vector<32x32xf32>, vector<32x128xf32>, vector<32x128xf32> -> vector<32x128xf32>
    %245 = arith.addf %241, %244 : vector<32x128xf32>
    %c127_i32_131 = arith.constant 127 : i32
    %246 = tpu.dynamic_rotate %165 by %c127_i32_131 dim 1 : vector<32x128xf32>, i32 -> vector<32x128xf32>
    %c127_i32_132 = arith.constant 127 : i32
    %247 = vector.broadcast %c127_i32_132 : i32 to vector<1x128xi32>
    %248 = arith.cmpi slt, %3, %247 : vector<1x128xi32>
    %cst_133 = arith.constant 0.000000e+00 : f32
    %249 = vector.broadcast %cst_133 : f32 to vector<32x128xf32>
    %250 = vector.shape_cast %248 : vector<1x128xi1> to vector<1x128xi1>
    %251 = vector.broadcast %250 : vector<1x128xi1> to vector<32x128xi1>
    %252 = arith.select %251, %246, %249 : vector<32x128xi1>, vector<32x128xf32>
    %c8_134 = arith.constant 8 : index
    %c0_135 = arith.constant 0 : index
    %c0_136 = arith.constant 0 : index
    %253 = vector.load %arg3[%c8_134, %c0_135, %c0_136] : memref<15x32x32xf32, #tpu.memory_space<vmem>>, vector<1x32x32xf32>
    %254 = vector.shape_cast %253 : vector<1x32x32xf32> to vector<32x32xf32>
    %cst_137 = arith.constant dense<0.000000e+00> : vector<32x128xf32>
    %255 = tpu.matmul %254, %252, %cst_137 {dimension_numbers = #tpu.dot_dimension_numbers<[1], [0], [0], [1], [0, 0, 1, 1], [], []>} : vector<32x32xf32>, vector<32x128xf32>, vector<32x128xf32> -> vector<32x128xf32>
    %256 = arith.addf %245, %255 : vector<32x128xf32>
    %c126_i32_138 = arith.constant 126 : i32
    %257 = tpu.dynamic_rotate %165 by %c126_i32_138 dim 1 : vector<32x128xf32>, i32 -> vector<32x128xf32>
    %c126_i32_139 = arith.constant 126 : i32
    %258 = vector.broadcast %c126_i32_139 : i32 to vector<1x128xi32>
    %259 = arith.cmpi slt, %3, %258 : vector<1x128xi32>
    %cst_140 = arith.constant 0.000000e+00 : f32
    %260 = vector.broadcast %cst_140 : f32 to vector<32x128xf32>
    %261 = vector.shape_cast %259 : vector<1x128xi1> to vector<1x128xi1>
    %262 = vector.broadcast %261 : vector<1x128xi1> to vector<32x128xi1>
    %263 = arith.select %262, %257, %260 : vector<32x128xi1>, vector<32x128xf32>
    %c9_141 = arith.constant 9 : index
    %c0_142 = arith.constant 0 : index
    %c0_143 = arith.constant 0 : index
    %264 = vector.load %arg3[%c9_141, %c0_142, %c0_143] : memref<15x32x32xf32, #tpu.memory_space<vmem>>, vector<1x32x32xf32>
    %265 = vector.shape_cast %264 : vector<1x32x32xf32> to vector<32x32xf32>
    %cst_144 = arith.constant dense<0.000000e+00> : vector<32x128xf32>
    %266 = tpu.matmul %265, %263, %cst_144 {dimension_numbers = #tpu.dot_dimension_numbers<[1], [0], [0], [1], [0, 0, 1, 1], [], []>} : vector<32x32xf32>, vector<32x128xf32>, vector<32x128xf32> -> vector<32x128xf32>
    %267 = arith.addf %256, %266 : vector<32x128xf32>
    %c125_i32_145 = arith.constant 125 : i32
    %268 = tpu.dynamic_rotate %165 by %c125_i32_145 dim 1 : vector<32x128xf32>, i32 -> vector<32x128xf32>
    %c125_i32_146 = arith.constant 125 : i32
    %269 = vector.broadcast %c125_i32_146 : i32 to vector<1x128xi32>
    %270 = arith.cmpi slt, %3, %269 : vector<1x128xi32>
    %cst_147 = arith.constant 0.000000e+00 : f32
    %271 = vector.broadcast %cst_147 : f32 to vector<32x128xf32>
    %272 = vector.shape_cast %270 : vector<1x128xi1> to vector<1x128xi1>
    %273 = vector.broadcast %272 : vector<1x128xi1> to vector<32x128xi1>
    %274 = arith.select %273, %268, %271 : vector<32x128xi1>, vector<32x128xf32>
    %c10_148 = arith.constant 10 : index
    %c0_149 = arith.constant 0 : index
    %c0_150 = arith.constant 0 : index
    %275 = vector.load %arg3[%c10_148, %c0_149, %c0_150] : memref<15x32x32xf32, #tpu.memory_space<vmem>>, vector<1x32x32xf32>
    %276 = vector.shape_cast %275 : vector<1x32x32xf32> to vector<32x32xf32>
    %cst_151 = arith.constant dense<0.000000e+00> : vector<32x128xf32>
    %277 = tpu.matmul %276, %274, %cst_151 {dimension_numbers = #tpu.dot_dimension_numbers<[1], [0], [0], [1], [0, 0, 1, 1], [], []>} : vector<32x32xf32>, vector<32x128xf32>, vector<32x128xf32> -> vector<32x128xf32>
    %278 = arith.addf %267, %277 : vector<32x128xf32>
    %c124_i32_152 = arith.constant 124 : i32
    %279 = tpu.dynamic_rotate %165 by %c124_i32_152 dim 1 : vector<32x128xf32>, i32 -> vector<32x128xf32>
    %c124_i32_153 = arith.constant 124 : i32
    %280 = vector.broadcast %c124_i32_153 : i32 to vector<1x128xi32>
    %281 = arith.cmpi slt, %3, %280 : vector<1x128xi32>
    %cst_154 = arith.constant 0.000000e+00 : f32
    %282 = vector.broadcast %cst_154 : f32 to vector<32x128xf32>
    %283 = vector.shape_cast %281 : vector<1x128xi1> to vector<1x128xi1>
    %284 = vector.broadcast %283 : vector<1x128xi1> to vector<32x128xi1>
    %285 = arith.select %284, %279, %282 : vector<32x128xi1>, vector<32x128xf32>
    %c11_155 = arith.constant 11 : index
    %c0_156 = arith.constant 0 : index
    %c0_157 = arith.constant 0 : index
    %286 = vector.load %arg3[%c11_155, %c0_156, %c0_157] : memref<15x32x32xf32, #tpu.memory_space<vmem>>, vector<1x32x32xf32>
    %287 = vector.shape_cast %286 : vector<1x32x32xf32> to vector<32x32xf32>
    %cst_158 = arith.constant dense<0.000000e+00> : vector<32x128xf32>
    %288 = tpu.matmul %287, %285, %cst_158 {dimension_numbers = #tpu.dot_dimension_numbers<[1], [0], [0], [1], [0, 0, 1, 1], [], []>} : vector<32x32xf32>, vector<32x128xf32>, vector<32x128xf32> -> vector<32x128xf32>
    %289 = arith.addf %278, %288 : vector<32x128xf32>
    %c123_i32_159 = arith.constant 123 : i32
    %290 = tpu.dynamic_rotate %165 by %c123_i32_159 dim 1 : vector<32x128xf32>, i32 -> vector<32x128xf32>
    %c123_i32_160 = arith.constant 123 : i32
    %291 = vector.broadcast %c123_i32_160 : i32 to vector<1x128xi32>
    %292 = arith.cmpi slt, %3, %291 : vector<1x128xi32>
    %cst_161 = arith.constant 0.000000e+00 : f32
    %293 = vector.broadcast %cst_161 : f32 to vector<32x128xf32>
    %294 = vector.shape_cast %292 : vector<1x128xi1> to vector<1x128xi1>
    %295 = vector.broadcast %294 : vector<1x128xi1> to vector<32x128xi1>
    %296 = arith.select %295, %290, %293 : vector<32x128xi1>, vector<32x128xf32>
    %c12_162 = arith.constant 12 : index
    %c0_163 = arith.constant 0 : index
    %c0_164 = arith.constant 0 : index
    %297 = vector.load %arg3[%c12_162, %c0_163, %c0_164] : memref<15x32x32xf32, #tpu.memory_space<vmem>>, vector<1x32x32xf32>
    %298 = vector.shape_cast %297 : vector<1x32x32xf32> to vector<32x32xf32>
    %cst_165 = arith.constant dense<0.000000e+00> : vector<32x128xf32>
    %299 = tpu.matmul %298, %296, %cst_165 {dimension_numbers = #tpu.dot_dimension_numbers<[1], [0], [0], [1], [0, 0, 1, 1], [], []>} : vector<32x32xf32>, vector<32x128xf32>, vector<32x128xf32> -> vector<32x128xf32>
    %300 = arith.addf %289, %299 : vector<32x128xf32>
    %c122_i32_166 = arith.constant 122 : i32
    %301 = tpu.dynamic_rotate %165 by %c122_i32_166 dim 1 : vector<32x128xf32>, i32 -> vector<32x128xf32>
    %c122_i32_167 = arith.constant 122 : i32
    %302 = vector.broadcast %c122_i32_167 : i32 to vector<1x128xi32>
    %303 = arith.cmpi slt, %3, %302 : vector<1x128xi32>
    %cst_168 = arith.constant 0.000000e+00 : f32
    %304 = vector.broadcast %cst_168 : f32 to vector<32x128xf32>
    %305 = vector.shape_cast %303 : vector<1x128xi1> to vector<1x128xi1>
    %306 = vector.broadcast %305 : vector<1x128xi1> to vector<32x128xi1>
    %307 = arith.select %306, %301, %304 : vector<32x128xi1>, vector<32x128xf32>
    %c13_169 = arith.constant 13 : index
    %c0_170 = arith.constant 0 : index
    %c0_171 = arith.constant 0 : index
    %308 = vector.load %arg3[%c13_169, %c0_170, %c0_171] : memref<15x32x32xf32, #tpu.memory_space<vmem>>, vector<1x32x32xf32>
    %309 = vector.shape_cast %308 : vector<1x32x32xf32> to vector<32x32xf32>
    %cst_172 = arith.constant dense<0.000000e+00> : vector<32x128xf32>
    %310 = tpu.matmul %309, %307, %cst_172 {dimension_numbers = #tpu.dot_dimension_numbers<[1], [0], [0], [1], [0, 0, 1, 1], [], []>} : vector<32x32xf32>, vector<32x128xf32>, vector<32x128xf32> -> vector<32x128xf32>
    %311 = arith.addf %300, %310 : vector<32x128xf32>
    %c121_i32_173 = arith.constant 121 : i32
    %312 = tpu.dynamic_rotate %165 by %c121_i32_173 dim 1 : vector<32x128xf32>, i32 -> vector<32x128xf32>
    %c121_i32_174 = arith.constant 121 : i32
    %313 = vector.broadcast %c121_i32_174 : i32 to vector<1x128xi32>
    %314 = arith.cmpi slt, %3, %313 : vector<1x128xi32>
    %cst_175 = arith.constant 0.000000e+00 : f32
    %315 = vector.broadcast %cst_175 : f32 to vector<32x128xf32>
    %316 = vector.shape_cast %314 : vector<1x128xi1> to vector<1x128xi1>
    %317 = vector.broadcast %316 : vector<1x128xi1> to vector<32x128xi1>
    %318 = arith.select %317, %312, %315 : vector<32x128xi1>, vector<32x128xf32>
    %c14_176 = arith.constant 14 : index
    %c0_177 = arith.constant 0 : index
    %c0_178 = arith.constant 0 : index
    %319 = vector.load %arg3[%c14_176, %c0_177, %c0_178] : memref<15x32x32xf32, #tpu.memory_space<vmem>>, vector<1x32x32xf32>
    %320 = vector.shape_cast %319 : vector<1x32x32xf32> to vector<32x32xf32>
    %cst_179 = arith.constant dense<0.000000e+00> : vector<32x128xf32>
    %321 = tpu.matmul %320, %318, %cst_179 {dimension_numbers = #tpu.dot_dimension_numbers<[1], [0], [0], [1], [0, 0, 1, 1], [], []>} : vector<32x32xf32>, vector<32x128xf32>, vector<32x128xf32> -> vector<32x128xf32>
    %322 = arith.addf %311, %321 : vector<32x128xf32>
    %323 = vector.extract_strided_slice %2 {offsets = [0, 0], sizes = [8, 128], strides = [1, 1]} : vector<32x128xf32> to vector<8x128xf32>
    %c0_180 = arith.constant 0 : index
    %c0_181 = arith.constant 0 : index
    %324 = vector.load %arg5[%c0_180, %c0_181] : memref<64x128xf32, #tpu.memory_space<vmem>>, vector<8x128xf32>
    tpu.vector_store %arg5[%c0_180, %c0_181], %323 {strides = array<i32>} : memref<64x128xf32, #tpu.memory_space<vmem>>, vector<8x128xf32>,
    %325 = vector.extract_strided_slice %322 {offsets = [0, 0], sizes = [8, 128], strides = [1, 1]} : vector<32x128xf32> to vector<8x128xf32>
    %c8_182 = arith.constant 8 : index
    %c0_183 = arith.constant 0 : index
    %326 = vector.load %arg5[%c8_182, %c0_183] : memref<64x128xf32, #tpu.memory_space<vmem>>, vector<8x128xf32>
    tpu.vector_store %arg5[%c8_182, %c0_183], %325 {strides = array<i32>} : memref<64x128xf32, #tpu.memory_space<vmem>>, vector<8x128xf32>,
    %327 = vector.extract_strided_slice %2 {offsets = [8, 0], sizes = [8, 128], strides = [1, 1]} : vector<32x128xf32> to vector<8x128xf32>
    %c16 = arith.constant 16 : index
    %c0_184 = arith.constant 0 : index
    %328 = vector.load %arg5[%c16, %c0_184] : memref<64x128xf32, #tpu.memory_space<vmem>>, vector<8x128xf32>
    tpu.vector_store %arg5[%c16, %c0_184], %327 {strides = array<i32>} : memref<64x128xf32, #tpu.memory_space<vmem>>, vector<8x128xf32>,
    %329 = vector.extract_strided_slice %322 {offsets = [8, 0], sizes = [8, 128], strides = [1, 1]} : vector<32x128xf32> to vector<8x128xf32>
    %c24 = arith.constant 24 : index
    %c0_185 = arith.constant 0 : index
    %330 = vector.load %arg5[%c24, %c0_185] : memref<64x128xf32, #tpu.memory_space<vmem>>, vector<8x128xf32>
    tpu.vector_store %arg5[%c24, %c0_185], %329 {strides = array<i32>} : memref<64x128xf32, #tpu.memory_space<vmem>>, vector<8x128xf32>,
    %331 = vector.extract_strided_slice %2 {offsets = [16, 0], sizes = [8, 128], strides = [1, 1]} : vector<32x128xf32> to vector<8x128xf32>
    %c32 = arith.constant 32 : index
    %c0_186 = arith.constant 0 : index
    %332 = vector.load %arg5[%c32, %c0_186] : memref<64x128xf32, #tpu.memory_space<vmem>>, vector<8x128xf32>
    tpu.vector_store %arg5[%c32, %c0_186], %331 {strides = array<i32>} : memref<64x128xf32, #tpu.memory_space<vmem>>, vector<8x128xf32>,
    %333 = vector.extract_strided_slice %322 {offsets = [16, 0], sizes = [8, 128], strides = [1, 1]} : vector<32x128xf32> to vector<8x128xf32>
    %c40 = arith.constant 40 : index
    %c0_187 = arith.constant 0 : index
    %334 = vector.load %arg5[%c40, %c0_187] : memref<64x128xf32, #tpu.memory_space<vmem>>, vector<8x128xf32>
    tpu.vector_store %arg5[%c40, %c0_187], %333 {strides = array<i32>} : memref<64x128xf32, #tpu.memory_space<vmem>>, vector<8x128xf32>,
    %335 = vector.extract_strided_slice %2 {offsets = [24, 0], sizes = [8, 128], strides = [1, 1]} : vector<32x128xf32> to vector<8x128xf32>
    %c48 = arith.constant 48 : index
    %c0_188 = arith.constant 0 : index
    %336 = vector.load %arg5[%c48, %c0_188] : memref<64x128xf32, #tpu.memory_space<vmem>>, vector<8x128xf32>
    tpu.vector_store %arg5[%c48, %c0_188], %335 {strides = array<i32>} : memref<64x128xf32, #tpu.memory_space<vmem>>, vector<8x128xf32>,
    %337 = vector.extract_strided_slice %322 {offsets = [24, 0], sizes = [8, 128], strides = [1, 1]} : vector<32x128xf32> to vector<8x128xf32>
    %c56 = arith.constant 56 : index
    %c0_189 = arith.constant 0 : index
    %338 = vector.load %arg5[%c56, %c0_189] : memref<64x128xf32, #tpu.memory_space<vmem>>, vector<8x128xf32>
    tpu.vector_store %arg5[%c56, %c0_189], %337 {strides = array<i32>} : memref<64x128xf32, #tpu.memory_space<vmem>>, vector<8x128xf32>,
    return
  }
  func.func @transform_0(%arg0: i32) -> (i32, i32) {
    %c0_i32 = arith.constant 0 : i32
    %c0_i32_0 = arith.constant 0 : i32
    return %arg0, %c0_i32 : i32, i32
  }
  func.func @transform_1(%arg0: i32) -> (i32, i32, i32) {
    %c0_i32 = arith.constant 0 : i32
    %c0_i32_0 = arith.constant 0 : i32
    %c0_i32_1 = arith.constant 0 : i32
    %c0_i32_2 = arith.constant 0 : i32
    return %c0_i32, %c0_i32_0, %c0_i32_1 : i32, i32, i32
  }
  func.func @transform_2(%arg0: i32) -> (i32, i32, i32) {
    %c0_i32 = arith.constant 0 : i32
    %c0_i32_0 = arith.constant 0 : i32
    %c0_i32_1 = arith.constant 0 : i32
    %c0_i32_2 = arith.constant 0 : i32
    return %c0_i32, %c0_i32_0, %c0_i32_1 : i32, i32, i32
  }
  func.func @transform_3(%arg0: i32) -> (i32, i32) {
    %c0_i32 = arith.constant 0 : i32
    %c0_i32_0 = arith.constant 0 : i32
    %c0_i32_1 = arith.constant 0 : i32
    return %c0_i32, %c0_i32_0 : i32, i32
  }
  func.func @transform_4(%arg0: i32) -> (i32, i32) {
    %c0_i32 = arith.constant 0 : i32
    %c0_i32_0 = arith.constant 0 : i32
    return %arg0, %c0_i32 : i32, i32
  }
}

</mosaic_0001>

<bundles_post_ra>
// kernel: forward.1
= control target key start
LH: loop header
LB: loop body
LE: loop exit
PB: predicated region body
PF: predicated region fallthrough
CT: control target
= control target key end

     0   :  { %9 = vsyncpa [#allocation3], 0  ;;  %s6745_s0 = inlined_call_operand.hbm [shape: f32[128,128], index: 0, kind: input, shape index: {}]   ;;  %s6746_s1 = inlined_call_operand.hbm [shape: f32[15,32,32], index: 1, kind: input, shape index: {}]   ;;  %s6747_s2 = inlined_call_operand.hbm [shape: f32[15,32,32], index: 2, kind: input, shape index: {}]   ;;  %s6748_s3 = inlined_call_operand.hbm [shape: f32[32,1], index: 3, kind: input, shape index: {}]   ;;  %s6749_s4 = inlined_call_operand.hbm [shape: f32[256,128], index: 4, kind: output, shape index: {}]  }
   0x1   :  { %11 = vsyncpa [#allocation3 + $0x1], 0 }
   0x2   :  { %12 = vsyncpa [#allocation6], 0 }
   0x3   :  { %13 = vsyncpa [#allocation9], 0 }
   0x4   :  { %14 = vsyncpa [#allocation4], 0 }
   0x5   :  { %16 = vsyncpa [#allocation4 + $0x1], 0  ;;  %s5964_s15 = smov 0   ;;  %s5966_s16 = smov 0  }
   0x6   :  { %s5968_s17 = smov 0   ;;  %s5970_s18 = smov 0  }
   0x7 LB: > { %s5985_s19 = sadd.s32 4294967295, %s5913_s18   ;;  %s3969_s20 = sadd.s32 4294967294, %s5913_s18   ;;  %s5913_s18 = sphi %s5970_s18, %s6799_s18   ;;  %s5909_s17 = sphi %s5968_s17, %s6798_s17   ;;  %s5905_s16 = sphi %s5966_s16, %s6797_s16   ;;  %s5901_s15 = sphi %s5964_s15, %s6796_s15  }
   0x8   : > { %p42_p0 = scmp.ne.s32.totalorder %s5905_s16, %s5901_s15  ;;  %p6750_p1 = scmp.eq.s32.totalorder %s5985_s19, 0 }
   0x9   : > { %p135_p3 = scmp.eq.s32.totalorder %s3969_s20, 3  ;;  %p3970_p5 = scmp.ge.s32.totalorder %s5913_s18, 1 }
   0xa   : > { %p5994_p4 = por %p6750_p1, %p42_p0  ;;  %p142_p7 = scmp.lt.s32.totalorder %s5913_s18, 5 }
   0xb   : > { %p5999_p6 = por %p135_p3, %p42_p0  ;;  %s5915_s24 = smov [#allocation5]  }
   0xc   : > { %s6753_s21 = scalar_select %p5994_p4, 1, 0 }
   0xd   : > { %s6754_s22 = scalar_select %p5999_p6, 1, 0 }
   0xe   : > { %p6004_p8 = pnand %p3970_p5, %p142_p7  ;;  %s154_s25 = sshll.u32 %s5915_s24, 4  ;;  %s6008_s25 = int_to_ptr.vmem [resolvable:$true] %s154_s25 }
   0xf   : > { %s5916_s27 = smov [#allocation7]   ;;  %s5917_s29 = smov [#allocation8]  }
  0x10   : > { %s6755_s23 = scalar_select %p6004_p8, 1, 0 }
  0x11   : > { %p5363_p9 = pneg %p6004_p8  ;;  %s167_s28 = sshll.u32 %s5916_s27, 4  ;;  %s6018_s28 = int_to_ptr.vmem [resolvable:$true] %s167_s28 }
  0x12   : > { %s6020_s30 = sshll.u32 %s5917_s29, 4  ;;  %s5725_s7 = scalar_lea.hbm %s6746_s1, 7680  ;;  %s181_s30 = int_to_ptr.vmem [resolvable:$true] %s6020_s30 }
  0x13   : > { %p6014_p10 = pnand %p5363_p9, %p6750_p1  ;;  %p5726_p11 = scmp.ne.s32.totalorder %s6746_s1, %s5725_s7 }
  0x14   : > { %p5732_p3 = scmp.lt.u32.totalorder %s5725_s7, %s6746_s1 }
  0x15   : > { %p6030_p12 = pneg %p6014_p10 }
  0x17   : > { %p5728_p13 = pnand %p6030_p12, %p5726_p11 }
  0x19   : > { %p5729_p0 = pneg %p5728_p13 }
  0x1b   : > { %p5734_p5 = pnand %p5732_p3, %p5729_p0 }
  0x1d   : > { %5737 = shalt.err (!%p5734_p5)
}
  0x1e   : > { %s5738_s13 = scalar_lea.vmem %s6008_s25, 7680  ;;  %p5746_p2 = scmp.lt.s32.totalorder %s6008_s25, %s6008_s25 }
  0x1f   : > { %p5739_p7 = scmp.ne.s32.totalorder %s6008_s25, %s5738_s13  ;;  %p5747_p6 = scmp.lt.s32.totalorder %s5738_s13, %s5738_s13 }
  0x21   : > { %p5741_p9 = pnand %p5739_p7, %p6030_p12  ;;  %p5748_p11 = por %p5747_p6, %p5746_p2 }
  0x23   : > { %p5742_p1 = pneg %p5741_p9 }
  0x25   : > { %p5749_p13 = pnand %p5748_p11, %p5742_p1 }
  0x27   : > { %5752 = shalt.err (!%p5749_p13)
}
  0x28   : > { %s5918_s14 = smov 128   ;;  %s5919_s20 = smov 8  }
  0x29   : > { %5366 = dma.hbm_to_vmem [thread:$0]  (!%p6014_p10), %s6746_s1, 7680, %s6008_s25, [#allocation6], %s5918_s14, %s5918_s14, %s5919_s20  }
  0x2a   : > { %s5753_s6 = scalar_lea.hbm %s6747_s2, 7680 }
  0x2b   : > { %p5754_p1 = scmp.ne.s32.totalorder %s6747_s2, %s5753_s6  ;;  %p5760_p0 = scmp.lt.u32.totalorder %s5753_s6, %s6747_s2 }
  0x2d   : > { %p5756_p2 = pnand %p5754_p1, %p6030_p12 }
  0x2f   : > { %p5757_p6 = pneg %p5756_p2 }
  0x31   : > { %p5762_p3 = pnand %p5760_p0, %p5757_p6 }
  0x33   : > { %5765 = shalt.err (!%p5762_p3)
}
  0x34   : > { %s5766_s25 = scalar_lea.vmem %s6018_s28, 7680  ;;  %p5774_p11 = scmp.lt.s32.totalorder %s6018_s28, %s6018_s28 }
  0x35   : > { %p5767_p5 = scmp.ne.s32.totalorder %s6018_s28, %s5766_s25  ;;  %p5775_p13 = scmp.lt.s32.totalorder %s5766_s25, %s5766_s25 }
  0x37   : > { %p5769_p7 = pnand %p5767_p5, %p6030_p12  ;;  %p5776_p1 = por %p5775_p13, %p5774_p11 }
  0x39   : > { %p5770_p9 = pneg %p5769_p7 }
  0x3b   : > { %p5777_p2 = pnand %p5776_p1, %p5770_p9 }
  0x3d   : > { %5780 = shalt.err (!%p5777_p2)
}
  0x3e   : > { %5369 = dma.hbm_to_vmem [thread:$0]  (!%p6014_p10), %s6747_s2, 7680, %s6018_s28, [#allocation6], %s5918_s14, %s5918_s14, %s5919_s20  }
  0x3f   : > { %s5781_s29 = scalar_lea.hbm %s6748_s3, 512 }
  0x40   : > { %p5782_p6 = scmp.ne.s32.totalorder %s6748_s3, %s5781_s29  ;;  %p5788_p5 = scmp.lt.u32.totalorder %s5781_s29, %s6748_s3 }
  0x42   : > { %p5784_p0 = pnand %p5782_p6, %p6030_p12 }
  0x44   : > { %p5785_p3 = pneg %p5784_p0 }
  0x46   : > { %p5790_p7 = pnand %p5788_p5, %p5785_p3 }
  0x48   : > { %5793 = shalt.err (!%p5790_p7)
}
  0x49   : > { %s5794_s9 = scalar_lea.vmem %s181_s30, 512  ;;  %p5802_p1 = scmp.lt.s32.totalorder %s181_s30, %s181_s30 }
  0x4a   : > { %p5795_p9 = scmp.ne.s32.totalorder %s181_s30, %s5794_s9  ;;  %p5803_p2 = scmp.lt.s32.totalorder %s5794_s9, %s5794_s9 }
  0x4c   : > { %p5797_p11 = pnand %p5795_p9, %p6030_p12  ;;  %p5804_p4 = por %p5803_p2, %p5802_p1 }
  0x4e   : > { %p5798_p13 = pneg %p5797_p11 }
  0x50   : > { %p5805_p8 = pnand %p5804_p4, %p5798_p13 }
  0x52   : > { %5808 = shalt.err (!%p5805_p8)
}
  0x53   : > { %5372 = dma.hbm_to_vmem [thread:$0]  (!%p6014_p10), %s6748_s3, 512, %s181_s30, [#allocation9], %s5918_s14, %s5918_s14, %s5919_s20  }
  0x54   : > { %s6103_s10 = sadd.s32 1, %s5913_s18   ;;  %s29_s25 = sadd.s32 1, %s5909_s17 }
  0x55   : > { %s26_s26 = ssub.s32 %s5913_s18, %s6103_s10  ;;  %p36_p8 = scmp.ne.s32.totalorder %s5909_s17, %s5905_s16 }
  0x56   : > { %p27_p4 = scmp.eq.s32.totalorder %s26_s26, 0  ;;  %p37_p12 = scmp.eq.s32.totalorder %s5913_s18, 0 }
  0x57   : > { %p5384_p6 = scmp.lt.s32.totalorder %s5913_s18, 4  ;;  %p6758_p3 = scmp.eq.s32.totalorder %s5985_s19, 3 }
  0x58   : > { %s6113_s12 = scalar_select %p27_p4, %s5909_s17, %s29_s25  }
  0x59   : > { %p38_p0 = por %p37_p12, %p36_p8  ;;  %p6117_p5 = por %p6758_p3, %p36_p8 }
  0x5a   : > { %s194_s24 = sand.u32 1, %s5909_s17   ;;  %s4221_s27 = sshll.u32 %s5913_s18, 9 }
  0x5b   : > { %s3975_s30 = sshll.u32 %s194_s24, 5  ;;  %s6126_s6 = scalar_lea.hbm %s6745_s0, %s4221_s27 }
  0x5c   : > { %s198_s7 = scalar_lea.vmem [#allocation2], %s3975_s30  ;;  %p6128_p10 = pnand %p5384_p6, %p38_p0 }
  0x5d   : > { %s205_s8 = sshll.u32 %s198_s7, 4  ;;  %s6134_s28 = scalar_lea.sflag [#allocation3], %s194_s24  ;;  %s6132_s8 = int_to_ptr.vmem [resolvable:$true] %s205_s8 }
  0x5e   : > { %s5809_s11 = scalar_lea.hbm %s6126_s6, 512  ;;  %p5811_p9 = pneg %p6128_p10 }
  0x5f   : > { %p5810_p7 = scmp.ne.s32.totalorder %s6126_s6, %s5809_s11  ;;  %s5814_s27 = scalar_lea.hbm %s6745_s0, 2048 }
  0x60   : > { %p5815_p1 = scmp.lt.u32.totalorder %s6126_s6, %s6745_s0  ;;  %p5816_p2 = scmp.lt.u32.totalorder %s5814_s27, %s5809_s11 }
  0x61   : > { %p5812_p11 = pnand %p5811_p9, %p5810_p7  ;;  %p5818_p8 = scmp.lt.u32.totalorder %s5809_s11, %s6126_s6 }
  0x62   : > { %p5817_p4 = por %p5816_p2, %p5815_p1 }
  0x63   : > { %p5813_p13 = pneg %p5812_p11 }
  0x64   : > { %p5819_p12 = por %p5818_p8, %p5817_p4 }
  0x66   : > { %p5820_p6 = pnand %p5819_p12, %p5813_p13 }
  0x68   : > { %5823 = shalt.err (!%p5820_p6)
}
  0x69   : > { %s5824_s24 = scalar_lea.vmem %s6132_s8, 512  ;;  %s5920_s5 = smov [#allocation2]  }
  0x6a   : > { %p5825_p0 = scmp.ne.s32.totalorder %s6132_s8, %s5824_s24  ;;  %s5829_s7 = sshll.u32 %s5920_s5, 4  ;;  %s5830_s7 = int_to_ptr.vmem [resolvable:$false] %s5829_s7 }
  0x6b   : > { %s5831_s26 = scalar_lea.vmem %s5830_s7, 1024  ;;  %p5832_p11 = scmp.lt.s32.totalorder %s6132_s8, %s5830_s7 }
  0x6c   : > { %p5827_p3 = pnand %p5825_p0, %p5811_p9  ;;  %p5833_p1 = scmp.lt.s32.totalorder %s5831_s26, %s5824_s24 }
  0x6e   : > { %p5828_p7 = pneg %p5827_p3  ;;  %p5834_p2 = por %p5833_p1, %p5832_p11 }
  0x70   : > { %p5835_p4 = pnand %p5834_p2, %p5828_p7 }
  0x72   : > { %5838 = shalt.err (!%p5835_p4)
}
  0x73   : > { %5376 = dma.hbm_to_vmem [thread:$0]  (!%p6128_p10), %s6126_s6, 512, %s6132_s8, %s6134_s28, %s5918_s14, %s5918_s14, %s5919_s20  }
  0x74   : > { %p6761_p9 = scmp.ne.s32.totalorder %s6755_s23, 0 }
  0x75   : > { %s6168_s11 = sand.u32 (!%p6761_p9), 1, %s5905_s16   ;;  %p6762_p13 = scmp.ne.s32.totalorder (!%p6761_p9), %s6753_s21, 0 }
  0x76   : > { %217 = sbr.rel (%p6761_p9) target bundleno = 1066 (0x42a), region = 36  ;;  %s3979_s25 = sshll.u32 (!%p6761_p9), %s6168_s11, 5 }
  0x77   : > { %s220_s27 = scalar_lea.sflag (!%p6761_p9), [#allocation3], %s6168_s11  ;;  %s223_s30 = scalar_lea.vmem (!%p6761_p9), [#allocation2], %s3979_s25 }
  0x7d   : > { %5884 = dma.done.wait (%p6762_p13), %s220_s27, 512  }
  0x7e   : > { %5886 = vsyncadd (%p6762_p13), %s220_s27, 4294966784  ;;  %p6763_p8 = scmp.eq.s32.totalorder %s5985_s19, 0 }
  0x80   : > { %5888 = dma.done.wait (%p6763_p8), [#allocation6], 15360   ;;  %p6764_p10 = pmov %p6763_p8 }
  0x81   : > { %p6765_p12 = pmov %p6763_p8 }
  0x82   : > { %5890 = vsyncadd (%p6764_p10), [#allocation6], 4294951936 }
  0x83   : > { %5892 = dma.done.wait (%p6765_p12), [#allocation9], 512   ;;  %p6766_p6 = pmov %p6763_p8 }
  0x84   : > { %v262_v0 = vld [vmem:[%s223_s30] sm:$0xff]  ;;  %v263_v1 = vld [vmem:[%s223_s30 + $0x8] sm:$0xff]  ;;  %v264_v2 = vld [vmem:[%s223_s30 + $0x10] sm:$0xff]  ;;  %vm311_vm0 = vcmask 261120   ;;  %s5921_s21 = smov 6   ;;  %s5922_s23 = smov 7   ;;  %v270_v11 = vlaneseq }
  0x85   : > { %5894 = vsyncadd (%p6766_p6), [#allocation9], 4294966784  ;;  %v6184_v3 = vmax.f32 %v262_v0, 0.0  ;;  %v6186_v4 = vmax.f32 %v263_v1, 0.0  ;;  %v265_v5 = vld [vmem:[%s223_s30 + $0x18] sm:$0xff]  ;;  %v6188_v6 = vmax.f32 %v264_v2, 0.0 }
  0x86   : > { %v307_v7 = vld [vmem:[#allocation5 + $0x20] sm:$0xff]  ;;  %v6190_v8 = vmax.f32 %v265_v5, 0.0  ;;  %s5923_s14 = smov 5   ;;  %s5924_s20 = smov 4   ;;  %v6225_v12 = vand.u32 127, %v270_v11  ;;  %v2065_v17 = vld [vmem:[#allocation8 + $0x8] sm:$0xff] }
  0x87   : > { %4471 = vmatprep.mubr.msk.f32.mxu0 %vm311_vm0, %v307_v7  ;;  %v5443_v9 = vpack.i.bf16 %v6186_v4, %v6184_v3  ;;  %s5925_s6 = smov 3   ;;  %s5926_s8 = smov 2   ;;  %v2064_v18 = vld [vmem:[#allocation8] sm:$0xff]  ;;  %v5935_v23 = vmov 0   ;;  %v2066_v28 = vld [vmem:[#allocation8 + $0x10] sm:$0xff]  ;;  %v2067_v29 = vld [vmem:[#allocation8 + $0x18] sm:$0xff] }
  0x88   : > { %v5448_v10 = vpack.i.bf16 %v6190_v8, %v6188_v6  ;;  %s5927_s9 = smov 1   ;;  %s5928_s28 = smov 127   ;;  %vm299_vm1 = vcmp.ge.s32.totalorder %v6225_v12, 6  ;;  %5584 = vset.pattern.permute.xlu1 %v5935_v23  ;;  %5583 = vset.pattern.permute.xlu0 %v5935_v23  ;;  %vm280_vm3 = vcmp.ge.s32.totalorder %v6225_v12, 7  ;;  %v308_v36 = vld [vmem:[#allocation5 + $0x28] sm:$0xff]  ;;  %v309_v40 = vld [vmem:[#allocation5 + $0x30] sm:$0xff] }
  0x89   : > { %5444 = vrot.lane.b32.xlu0 %v5443_v9, %s5921_s21  ;;  %5454 = vrot.lane.b32.xlu1 %v5443_v9, %s5922_s23  ;;  %s5929_s29 = smov 126   ;;  %s5930_s24 = smov 125   ;;  %vm6228_vm2 = vmpackc.low %vm299_vm1, %vm299_vm1  ;;  %vm514_vm5 = vcmp.ge.s32.totalorder %v6225_v12, 5  ;;  %v310_v42 = vld [vmem:[#allocation5 + $0x38] sm:$0xff]  ;;  %v287_v46 = vld [vmem:[#allocation5] sm:$0xff]  ;;  %vm635_vm7 = vcmp.ge.s32.totalorder %v6225_v12, 4 }
  0x8a   : > { %s5931_s5 = smov 124   ;;  %s5932_s7 = smov 123   ;;  %vm6237_vm4 = vmpackc.low %vm280_vm3, %vm280_vm3  ;;  %v288_v49 = vld [vmem:[#allocation5 + $0x8] sm:$0xff]  ;;  %v289_v53 = vld [vmem:[#allocation5 + $0x10] sm:$0xff]  ;;  %vm756_vm9 = vcmp.ge.s32.totalorder %v6225_v12, 3  ;;  %vm877_vm11 = vcmp.ge.s32.totalorder %v6225_v12, 2 }
  0x8b   : > { %s5933_s26 = smov 122   ;;  %s5934_s25 = smov 121   ;;  %vm6254_vm6 = vmpackc.low %vm514_vm5, %vm514_vm5  ;;  %v290_v55 = vld [vmem:[#allocation5 + $0x18] sm:$0xff]  ;;  %v522_v59 = vld [vmem:[#allocation5 + $0x40] sm:$0xff]  ;;  %vm998_vm13 = vcmp.ge.s32.totalorder %v6225_v12, 1  ;;  %vm1225_vm15 = vcmp.lt.s32.totalorder %v6225_v12, 127 }
  0x8c   : > { %vm6271_vm8 = vmpackc.low %vm635_vm7, %vm635_vm7  ;;  %v523_v62 = vld [vmem:[#allocation5 + $0x48] sm:$0xff]  ;;  %v524_v2 = vld [vmem:[#allocation5 + $0x50] sm:$0xff]  ;;  %vm1346_vm3 = vcmp.lt.s32.totalorder %v6225_v12, 126  ;;  %vm1467_vm7 = vcmp.lt.s32.totalorder %v6225_v12, 125  ;;  %s3983_s27 = sshll.u32 %s6168_s11, 6 }
  0x8d   : > { %5449 = vrot.lane.b32.xlu0 %v5448_v10, %s5921_s21  ;;  %5459 = vrot.lane.b32.xlu1 %v5448_v10, %s5922_s23  ;;  %v525_v7 = vld [vmem:[#allocation5 + $0x58] sm:$0xff]  ;;  %vm6288_vm10 = vmpackc.low %vm756_vm9, %vm756_vm9  ;;  %s6506_s30 = scalar_lea.vmem [#allocation10], %s3983_s27  ;;  %v2108_v19 = vld [vmem:[#allocation7] sm:$0xff] }
  0x8e   : > { %v646_v23 = vld [vmem:[#allocation5 + $0x78] sm:$0xff]  ;;  %vm6305_vm12 = vmpackc.low %vm877_vm11, %vm877_vm11  ;;  %vm1588_vm11 = vcmp.lt.s32.totalorder %v6225_v12, 124  ;;  %3845 = vst [vmem:[%s6506_s30] sm:$0xff] %v6184_v3 }
  0x8f   : > { %vm6322_vm14 = vmpackc.low %vm998_vm13, %vm998_vm13  ;;  %3847 = vst [vmem:[%s6506_s30 + $0x10] sm:$0xff] %v6186_v4  ;;  %v2111_v34 = vld [vmem:[#allocation7 + $0x18] sm:$0xff] }
  0x90   : > { %vm6349_vm1 = vmpackc.low %vm1225_vm15, %vm1225_vm15  ;;  %vm1709_vm15 = vcmp.lt.s32.totalorder %v6225_v12, 123  ;;  %3849 = vst [vmem:[%s6506_s30 + $0x20] sm:$0xff] %v6188_v6  ;;  %v2339_v47 = vld [vmem:[#allocation7 + $0x58] sm:$0xff] }
  0x91   : > { %5464 = vrot.lane.b32.xlu0 %v5443_v9, %s5923_s14  ;;  %5469 = vrot.lane.b32.xlu1 %v5448_v10, %s5923_s14  ;;  %vm6364_vm5 = vmpackc.low %vm1346_vm3, %vm1346_vm3  ;;  %3851 = vst [vmem:[%s6506_s30 + $0x30] sm:$0xff] %v6190_v8  ;;  %v2457_v60 = vld [vmem:[#allocation7 + $0x78] sm:$0xff] }
  0x92   : > { %vm6381_vm9 = vmpackc.low %vm1467_vm7, %vm1467_vm7  ;;  %vm1830_vm7 = vcmp.lt.s32.totalorder %v6225_v12, 122 }
  0x93   : > { %vm6398_vm13 = vmpackc.low %vm1588_vm11, %vm1588_vm11 }
  0x94   : > { %vm6415_vm3 = vmpackc.low %vm1709_vm15, %vm1709_vm15  ;;  %vm1951_vm15 = vcmp.lt.s32.totalorder %v6225_v12, 121  ;;  %v1839_v12 = vld [vmem:[#allocation5 + $0x1a8] sm:$0xff] }
  0x95   : > { %5474 = vrot.lane.b32.xlu0 %v5443_v9, %s5924_s20  ;;  %5479 = vrot.lane.b32.xlu1 %v5448_v10, %s5924_s20  ;;  %vm6432_vm11 = vmpackc.low %vm1830_vm7, %vm1830_vm7 }
  0x96   : > { %vm6449_vm7 = vmpackc.low %vm1951_vm15, %vm1951_vm15 }
  0x99   : > { %5484 = vrot.lane.b32.xlu0 %v5443_v9, %s5925_s6  ;;  %5489 = vrot.lane.b32.xlu1 %v5448_v10, %s5925_s6 }
  0x9d   : > { %5494 = vrot.lane.b32.xlu0 %v5443_v9, %s5926_s8  ;;  %5499 = vrot.lane.b32.xlu1 %v5448_v10, %s5926_s8 }
  0xa1   : > { %5504 = vrot.lane.b32.xlu0 %v5443_v9, %s5927_s9  ;;  %5509 = vrot.lane.b32.xlu1 %v5448_v10, %s5927_s9 }
  0xa5   : > { %5514 = vrot.lane.b32.xlu0 %v5443_v9, %s5928_s28  ;;  %5519 = vrot.lane.b32.xlu1 %v5448_v10, %s5928_s28 }
  0xa9   : > { %5524 = vrot.lane.b32.xlu0 %v5443_v9, %s5929_s29  ;;  %5529 = vrot.lane.b32.xlu1 %v5448_v10, %s5929_s29 }
  0xad   : > { %5534 = vrot.lane.b32.xlu0 %v5443_v9, %s5930_s24  ;;  %5539 = vrot.lane.b32.xlu1 %v5448_v10, %s5930_s24 }
  0xb1   : > { %5544 = vrot.lane.b32.xlu0 %v5443_v9, %s5931_s5  ;;  %5549 = vrot.lane.b32.xlu1 %v5448_v10, %s5931_s5 }
  0xb5   : > { %5554 = vrot.lane.b32.xlu0 %v5443_v9, %s5932_s7  ;;  %5559 = vrot.lane.b32.xlu1 %v5448_v10, %s5932_s7 }
  0xb9   : > { %5564 = vrot.lane.b32.xlu0 %v5443_v9, %s5933_s26  ;;  %5569 = vrot.lane.b32.xlu1 %v5448_v10, %s5933_s26 }
  0xbd   : > { %5574 = vrot.lane.b32.xlu0 %v5443_v9, %s5934_s25  ;;  %5579 = vrot.lane.b32.xlu1 %v5448_v10, %s5934_s25 }
  0xc1   : > { %2075 = vperm.xlu1 %5584, %v2065_v17   ;;  %2070 = vperm.xlu0 %5583, %v2064_v18  }
  0xc5   : > { %2080 = vperm.xlu1 %5584, %v2066_v28   ;;  %2085 = vperm.xlu0 %5583, %v2067_v29   ;;  %v2808_v28 = vld [vmem:[#allocation7 + $0xc0] sm:$0xff] }
  0xfb   : > { %v5445_v13 = vpop.permute.xlu0 %5444  ;;  %v5455_v14 = vpop.permute.xlu1 %5454 }
  0xfc   : > { %v5447_v15 = vunpack.i.h.bf16 %v5445_v13  ;;  %v5446_v16 = vunpack.i.l.bf16 %v5445_v13  ;;  %v5457_v21 = vunpack.i.h.bf16 %v5455_v14  ;;  %v5456_v22 = vunpack.i.l.bf16 %v5455_v14  ;;  %v643_v13 = vld [vmem:[#allocation5 + $0x60] sm:$0xff]  ;;  %v2575_v14 = vld [vmem:[#allocation7 + $0x98] sm:$0xff] }
  0xfe   : > { %v4883_v20 = vpack.c.bf16 %v5447_v15, %v5446_v16  ;;  %v4895_v31 = vpack.c.bf16 %v5457_v21, %v5456_v22  ;;  %v644_v16 = vld [vmem:[#allocation5 + $0x68] sm:$0xff]  ;;  %v645_v21 = vld [vmem:[#allocation5 + $0x70] sm:$0xff] }
  0xff   : > { %v5450_v24 = vpop.permute.xlu0 %5449  ;;  %v5460_v25 = vpop.permute.xlu1 %5459 }
 0x100   : > { %v5452_v26 = vunpack.i.h.bf16 %v5450_v24  ;;  %v5451_v27 = vunpack.i.l.bf16 %v5450_v24  ;;  %4885 = vmatprep.subr.msk.bf16.mxu0 %vm6228_vm2, %v4883_v20  ;;  %v5462_v32 = vunpack.i.h.bf16 %v5460_v25  ;;  %v5461_v33 = vunpack.i.l.bf16 %v5460_v25 }
 0x101   : > { %4888 = vmatpush3.bf16.msk.msra.mxu0 %vm6228_vm2, %v4883_v20 }
 0x102   : > { %v4889_v30 = vpack.c.bf16 %v5452_v26, %v5451_v27  ;;  %v4901_v37 = vpack.c.bf16 %v5462_v32, %v5461_v33  ;;  %v764_v27 = vld [vmem:[#allocation5 + $0x80] sm:$0xff] }
 0x103   : > { %v5465_v35 = vpop.permute.xlu0 %5464  ;;  %v5470_v41 = vpop.permute.xlu1 %5469 }
 0x104   : > { %4891 = vmatprep.subr.msk.bf16.mxu0 %vm6228_vm2, %v4889_v30  ;;  %v5467_v38 = vunpack.i.h.bf16 %v5465_v35  ;;  %v5466_v39 = vunpack.i.l.bf16 %v5465_v35  ;;  %v5472_v44 = vunpack.i.h.bf16 %v5470_v41  ;;  %v5471_v45 = vunpack.i.l.bf16 %v5470_v41  ;;  %v766_v35 = vld [vmem:[#allocation5 + $0x90] sm:$0xff]  ;;  %v885_v41 = vld [vmem:[#allocation5 + $0xa0] sm:$0xff] }
 0x105   : > { %4894 = vmatpush3.bf16.msk.msra.mxu0 %vm6228_vm2, %v4889_v30  ;;  %v765_v30 = vld [vmem:[#allocation5 + $0x88] sm:$0xff] }
 0x106   : > { %4897 = vmatprep.subr.msk.bf16.mxu0 %vm6237_vm4, %v4895_v31  ;;  %v4907_v43 = vpack.c.bf16 %v5467_v38, %v5466_v39  ;;  %v4913_v50 = vpack.c.bf16 %v5472_v44, %v5471_v45  ;;  %v887_v45 = vld [vmem:[#allocation5 + $0xb0] sm:$0xff] }
 0x107   : > { %v5475_v48 = vpop.permute.xlu0 %5474  ;;  %v5480_v54 = vpop.permute.xlu1 %5479 }
 0x108   : > { %4472 = vmatmul.mubr.msk.f32.vlgmr.msra.gmra.mrb[0].mxu0 %vm311_vm0, %v308_v36  ;;  %v5477_v51 = vunpack.i.h.bf16 %v5475_v48  ;;  %v5476_v52 = vunpack.i.l.bf16 %v5475_v48  ;;  %v5482_v57 = vunpack.i.h.bf16 %v5480_v54  ;;  %v5481_v58 = vunpack.i.l.bf16 %v5480_v54  ;;  %v1006_v48 = vld [vmem:[#allocation5 + $0xc0] sm:$0xff]  ;;  %v1008_v54 = vld [vmem:[#allocation5 + $0xd0] sm:$0xff] }
 0x109   : > { %4900 = vmatpush3.bf16.msk.msra.mxu0 %vm6237_vm4, %v4895_v31  ;;  %4474 = vmatprep.mubr.msk.f32.mxu0 %vm311_vm0, %v309_v40 }
 0x10a   : > { %4903 = vmatprep.subr.msk.bf16.mxu0 %vm6237_vm4, %v4901_v37  ;;  %v4919_v56 = vpack.c.bf16 %v5477_v51, %v5476_v52  ;;  %v4925_v63 = vpack.c.bf16 %v5482_v57, %v5481_v58  ;;  %v1007_v51 = vld [vmem:[#allocation5 + $0xc8] sm:$0xff]  ;;  %v1009_v57 = vld [vmem:[#allocation5 + $0xd8] sm:$0xff] }
 0x10b   : > { %v5485_v61 = vpop.permute.xlu0 %5484  ;;  %v5490_v5 = vpop.permute.xlu1 %5489 }
 0x10c   : > { %4475 = vmatmul.mubr.msk.f32.gmra.mrb[2].mxu0 %vm311_vm0, %v310_v42  ;;  %v5487_v0 = vunpack.i.h.bf16 %v5485_v61  ;;  %v5486_v1 = vunpack.i.l.bf16 %v5485_v61  ;;  %v5492_v10 = vunpack.i.h.bf16 %v5490_v5  ;;  %v5491_v11 = vunpack.i.l.bf16 %v5490_v5  ;;  %v2914_v42 = vld [vmem:[#allocation7 + $0xe0] sm:$0xff] }
 0x10d   : > { %4906 = vmatpush3.bf16.msk.msra.mxu0 %vm6237_vm4, %v4901_v37  ;;  %4485 = vmatprep.mubr.msk.f32.mxu0 %vm311_vm0, %v287_v46  ;;  %v767_v37 = vld [vmem:[#allocation5 + $0x98] sm:$0xff] }
 0x10e   : > { %4909 = vmatprep.subr.msk.bf16.mxu0 %vm6254_vm6, %v4907_v43  ;;  %v4931_v9 = vpack.c.bf16 %v5487_v0, %v5486_v1  ;;  %v4937_v17 = vpack.c.bf16 %v5492_v10, %v5491_v11  ;;  %v888_v46 = vld [vmem:[#allocation5 + $0xb8] sm:$0xff]  ;;  %v1113_v1 = vld [vmem:[#allocation5 + $0xe8] sm:$0xff] }
 0x10f   : > { %v5495_v15 = vpop.permute.xlu0 %5494  ;;  %v5500_v22 = vpop.permute.xlu1 %5499  ;;  %v1115_v11 = vld [vmem:[#allocation5 + $0xf8] sm:$0xff] }
 0x110   : > { %4486 = vmatmul.mubr.msk.f32.vlgmr.msra.gmra.mrb[0].mxu0 %vm311_vm0, %v288_v49  ;;  %v5497_v18 = vunpack.i.h.bf16 %v5495_v15  ;;  %v5496_v20 = vunpack.i.l.bf16 %v5495_v15  ;;  %v5502_v25 = vunpack.i.h.bf16 %v5500_v22  ;;  %v5501_v26 = vunpack.i.l.bf16 %v5500_v22 }
 0x111   : > { %4912 = vmatpush3.bf16.msk.msra.mxu0 %vm6254_vm6, %v4907_v43  ;;  %4488 = vmatprep.mubr.msk.f32.mxu0 %vm311_vm0, %v289_v53  ;;  %v886_v43 = vld [vmem:[#allocation5 + $0xa8] sm:$0xff]  ;;  %v4967_v49 = vpack.c.bf16 %v6186_v4, %v6184_v3 }
 0x112   : > { %4915 = vmatprep.subr.msk.bf16.mxu0 %vm6254_vm6, %v4913_v50  ;;  %v4943_v24 = vpack.c.bf16 %v5497_v18, %v5496_v20  ;;  %v4949_v31 = vpack.c.bf16 %v5502_v25, %v5501_v26  ;;  %v1235_v25 = vld [vmem:[#allocation5 + $0x110] sm:$0xff]  ;;  %v3153_v18 = vld [vmem:[#allocation7 + $0x138] sm:$0xff] }
 0x113   : > { %v5505_v29 = vpop.permute.xlu0 %5504  ;;  %v5510_v36 = vpop.permute.xlu1 %5509 }
 0x114   : > { %4489 = vmatmul.mubr.msk.f32.gmra.mrb[2].mxu0 %vm311_vm0, %v290_v55  ;;  %v5507_v32 = vunpack.i.h.bf16 %v5505_v29  ;;  %v5506_v33 = vunpack.i.l.bf16 %v5505_v29  ;;  %v5512_v39 = vunpack.i.h.bf16 %v5510_v36  ;;  %v5511_v40 = vunpack.i.l.bf16 %v5510_v36  ;;  %v1355_v36 = vld [vmem:[#allocation5 + $0x128] sm:$0xff] }
 0x115   : > { %4918 = vmatpush3.bf16.msk.msra.mxu0 %vm6254_vm6, %v4913_v50  ;;  %4499 = vmatprep.mubr.msk.f32.mxu0 %vm311_vm0, %v522_v59  ;;  %v4971_v55 = vpack.c.bf16 %v6190_v8, %v6188_v6  ;;  %v2126_v8 = vld [vmem:[#allocation7 + $0x28] sm:$0xff] }
 0x116   : > { %4921 = vmatprep.subr.msk.bf16.mxu0 %vm6271_vm8, %v4919_v56  ;;  %v4955_v38 = vpack.c.bf16 %v5507_v32, %v5506_v33  ;;  %v4961_v44 = vpack.c.bf16 %v5512_v39, %v5511_v40  ;;  %v1354_v32 = vld [vmem:[#allocation5 + $0x120] sm:$0xff]  ;;  %v1356_v40 = vld [vmem:[#allocation5 + $0x130] sm:$0xff]  ;;  %v3271_v33 = vld [vmem:[#allocation7 + $0x158] sm:$0xff] }
 0x117   : > { %v5515_v50 = vpop.permute.xlu0 %5514 }
 0x118   : > { %4500 = vmatmul.mubr.msk.f32.vlgmr.msra.gmra.mrb[0].mxu0 %vm311_vm0, %v523_v62  ;;  %v5517_v52 = vunpack.i.h.bf16 %v5515_v50  ;;  %v5516_v53 = vunpack.i.l.bf16 %v5515_v50  ;;  %v1112_v62 = vld [vmem:[#allocation5 + $0xe0] sm:$0xff] }
 0x119   : > { %4924 = vmatpush3.bf16.msk.msra.mxu0 %vm6271_vm8, %v4919_v56  ;;  %4502 = vmatprep.mubr.msk.f32.mxu0 %vm311_vm0, %v524_v2  ;;  %v5520_v56 = vpop.permute.xlu1 %5519 }
 0x11a   : > { %4927 = vmatprep.subr.msk.bf16.mxu0 %vm6271_vm8, %v4925_v63  ;;  %v4975_v58 = vpack.c.bf16 %v5517_v52, %v5516_v53  ;;  %v5522_v59 = vunpack.i.h.bf16 %v5520_v56  ;;  %v5521_v61 = vunpack.i.l.bf16 %v5520_v56 }
 0x11b   : > { %v5525_v0 = vpop.permute.xlu0 %5524 }
 0x11c   : > { %4503 = vmatmul.mubr.msk.f32.gmra.mrb[2].mxu0 %vm311_vm0, %v525_v7  ;;  %v4981_v2 = vpack.c.bf16 %v5522_v59, %v5521_v61  ;;  %v5527_v5 = vunpack.i.h.bf16 %v5525_v0  ;;  %v5526_v7 = vunpack.i.l.bf16 %v5525_v0  ;;  %v3507_v0 = vld [vmem:[#allocation7 + $0x198] sm:$0xff] }
 0x11d   : > { %4930 = vmatpush3.bf16.msk.msra.mxu0 %vm6271_vm8, %v4925_v63  ;;  %4513 = vmatprep.mubr.msk.f32.mxu0 %vm311_vm0, %v643_v13  ;;  %v5530_v10 = vpop.permute.xlu1 %5529  ;;  %v3035_v63 = vld [vmem:[#allocation7 + $0x118] sm:$0xff] }
 0x11e   : > { %4933 = vmatprep.subr.msk.bf16.mxu0 %vm6288_vm10, %v4931_v9  ;;  %v4987_v13 = vpack.c.bf16 %v5527_v5, %v5526_v7  ;;  %v5532_v15 = vunpack.i.h.bf16 %v5530_v10 }
 0x11f   : > { %v5535_v20 = vpop.permute.xlu0 %5534 }
 0x120   : > { %4514 = vmatmul.mubr.msk.f32.vlgmr.msra.gmra.mrb[0].mxu0 %vm311_vm0, %v644_v16  ;;  %v5531_v16 = vunpack.i.l.bf16 %v5530_v10  ;;  %v1598_v10 = vld [vmem:[#allocation5 + $0x170] sm:$0xff] }
 0x121   : > { %4936 = vmatpush3.bf16.msk.msra.mxu0 %vm6288_vm10, %v4931_v9  ;;  %4516 = vmatprep.mubr.msk.f32.mxu0 %vm311_vm0, %v645_v21  ;;  %v1114_v9 = vld [vmem:[#allocation5 + $0xf0] sm:$0xff]  ;;  %v1234_v21 = vld [vmem:[#allocation5 + $0x108] sm:$0xff]  ;;  %v5540_v26 = vpop.permute.xlu1 %5539 }
 0x122   : > { %4939 = vmatprep.subr.msk.bf16.mxu0 %vm6288_vm10, %v4937_v17  ;;  %v4993_v22 = vpack.c.bf16 %v5532_v15, %v5531_v16 }
 0x124   : > { %4517 = vmatmul.mubr.msk.f32.gmra.mrb[2].mxu0 %vm311_vm0, %v646_v23  ;;  %v5537_v23 = vunpack.i.h.bf16 %v5535_v20 }
 0x125   : > { %4942 = vmatpush3.bf16.msk.msra.mxu0 %vm6288_vm10, %v4937_v17  ;;  %4527 = vmatprep.mubr.msk.f32.mxu0 %vm311_vm0, %v764_v27  ;;  %v1233_v17 = vld [vmem:[#allocation5 + $0x100] sm:$0xff]  ;;  %v1236_v27 = vld [vmem:[#allocation5 + $0x118] sm:$0xff] }
 0x126   : > { %4945 = vmatprep.subr.msk.bf16.mxu0 %vm6305_vm12, %v4943_v24 }
 0x128   : > { %4528 = vmatmul.mubr.msk.f32.vlgmr.msra.gmra.mrb[0].mxu0 %vm311_vm0, %v765_v30  ;;  %v5542_v30 = vunpack.i.h.bf16 %v5540_v26 }
 0x129   : > { %4948 = vmatpush3.bf16.msk.msra.mxu0 %vm6305_vm12, %v4943_v24  ;;  %4530 = vmatprep.mubr.msk.f32.mxu0 %vm311_vm0, %v766_v35  ;;  %v5536_v24 = vunpack.i.l.bf16 %v5535_v20  ;;  %v5545_v35 = vpop.permute.xlu0 %5544  ;;  %v1717_v20 = vld [vmem:[#allocation5 + $0x180] sm:$0xff] }
 0x12a   : > { %4951 = vmatprep.subr.msk.bf16.mxu0 %vm6305_vm12, %v4949_v31  ;;  %v5546_v39 = vunpack.i.l.bf16 %v5545_v35 }
 0x12b   : > { %v4999_v29 = vpack.c.bf16 %v5537_v23, %v5536_v24  ;;  %v1718_v23 = vld [vmem:[#allocation5 + $0x188] sm:$0xff] }
 0x12c   : > { %4531 = vmatmul.mubr.msk.f32.gmra.mrb[2].mxu0 %vm311_vm0, %v767_v37 }
 0x12d   : > { %4954 = vmatpush3.bf16.msk.msra.mxu0 %vm6305_vm12, %v4949_v31  ;;  %4541 = vmatprep.mubr.msk.f32.mxu0 %vm311_vm0, %v885_v41  ;;  %v5541_v31 = vunpack.i.l.bf16 %v5540_v26  ;;  %v5550_v41 = vpop.permute.xlu1 %5549  ;;  %v5555_v50 = vpop.permute.xlu0 %5554 }
 0x12e   : > { %4957 = vmatprep.subr.msk.bf16.mxu0 %vm6322_vm14, %v4955_v38  ;;  %v5557_v53 = vunpack.i.h.bf16 %v5555_v50 }
 0x12f   : > { %v5005_v37 = vpack.c.bf16 %v5542_v30, %v5541_v31  ;;  %v1720_v30 = vld [vmem:[#allocation5 + $0x198] sm:$0xff] }
 0x130   : > { %4542 = vmatmul.mubr.msk.f32.vlgmr.msra.gmra.mrb[0].mxu0 %vm311_vm0, %v886_v43  ;;  %v1357_v43 = vld [vmem:[#allocation5 + $0x138] sm:$0xff] }
 0x131   : > { %4960 = vmatpush3.bf16.msk.msra.mxu0 %vm6322_vm14, %v4955_v38  ;;  %4544 = vmatprep.mubr.msk.f32.mxu0 %vm311_vm0, %v887_v45  ;;  %v5547_v38 = vunpack.i.h.bf16 %v5545_v35  ;;  %v5552_v45 = vunpack.i.h.bf16 %v5550_v41  ;;  %v5560_v56 = vpop.permute.xlu1 %5559 }
 0x132   : > { %4963 = vmatprep.subr.msk.bf16.mxu0 %vm6322_vm14, %v4961_v44  ;;  %v5562_v59 = vunpack.i.h.bf16 %v5560_v56  ;;  %v5561_v61 = vunpack.i.l.bf16 %v5560_v56 }
 0x134   : > { %4545 = vmatmul.mubr.msk.f32.gmra.mrb[2].mxu0 %vm311_vm0, %v888_v46  ;;  %v5551_v46 = vunpack.i.l.bf16 %v5550_v41  ;;  %v5029_v5 = vpack.c.bf16 %v5562_v59, %v5561_v61  ;;  %v1959_v41 = vld [vmem:[#allocation5 + $0x1c0] sm:$0xff] }
 0x135   : > { %4966 = vmatpush3.bf16.msk.msra.mxu0 %vm6322_vm14, %v4961_v44  ;;  %4555 = vmatprep.mubr.msk.f32.mxu0 %vm311_vm0, %v1006_v48  ;;  %v5011_v44 = vpack.c.bf16 %v5547_v38, %v5546_v39  ;;  %v1475_v48 = vld [vmem:[#allocation5 + $0x140] sm:$0xff]  ;;  %v1840_v39 = vld [vmem:[#allocation5 + $0x1b0] sm:$0xff] }
 0x136   : > { %4968 = vmatprep.subr.bf16.mxu0 %v4967_v49  ;;  %v5017_v52 = vpack.c.bf16 %v5552_v45, %v5551_v46  ;;  %v1962_v45 = vld [vmem:[#allocation5 + $0x1d8] sm:$0xff] }
 0x138   : > { %4556 = vmatmul.mubr.msk.f32.vlgmr.msra.gmra.mrb[0].mxu0 %vm311_vm0, %v1007_v51  ;;  %v1476_v51 = vld [vmem:[#allocation5 + $0x148] sm:$0xff] }
 0x139   : > { %4970 = vmatpush3.bf16.msra.mxu0 %v4967_v49  ;;  %4558 = vmatprep.mubr.msk.f32.mxu0 %vm311_vm0, %v1008_v54  ;;  %v5556_v54 = vunpack.i.l.bf16 %v5555_v50  ;;  %v3389_v49 = vld [vmem:[#allocation7 + $0x178] sm:$0xff] }
 0x13a   : > { %4972 = vmatprep.subr.bf16.mxu0 %v4971_v55 }
 0x13c   : > { %4559 = vmatmul.mubr.msk.f32.gmra.mrb[2].mxu0 %vm311_vm0, %v1009_v57  ;;  %v1478_v57 = vld [vmem:[#allocation5 + $0x158] sm:$0xff] }
 0x13d   : > { %4974 = vmatpush3.bf16.msra.mxu0 %v4971_v55  ;;  %4569 = vmatprep.mubr.msk.f32.mxu0 %vm311_vm0, %v1112_v62  ;;  %v1477_v55 = vld [vmem:[#allocation5 + $0x150] sm:$0xff]  ;;  %v1596_v62 = vld [vmem:[#allocation5 + $0x160] sm:$0xff] }
 0x13e   : > { %4977 = vmatprep.subr.msk.bf16.mxu0 %vm6349_vm1, %v4975_v58 }
 0x140   : > { %4570 = vmatmul.mubr.msk.f32.vlgmr.msra.gmra.mrb[0].mxu0 %vm311_vm0, %v1113_v1  ;;  %v5565_v1 = vpop.permute.xlu0 %5564 }
 0x141   : > { %4980 = vmatpush3.bf16.msk.msra.mxu0 %vm6349_vm1, %v4975_v58  ;;  %4572 = vmatprep.mubr.msk.f32.mxu0 %vm311_vm0, %v1114_v9  ;;  %v5023_v58 = vpack.c.bf16 %v5557_v53, %v5556_v54  ;;  %v5567_v7 = vunpack.i.h.bf16 %v5565_v1  ;;  %v5566_v9 = vunpack.i.l.bf16 %v5565_v1 }
 0x142   : > { %4983 = vmatprep.subr.msk.bf16.mxu0 %vm6349_vm1, %v4981_v2 }
 0x143   : > { %v5035_v15 = vpack.c.bf16 %v5567_v7, %v5566_v9 }
 0x144   : > { %4573 = vmatmul.mubr.msk.f32.gmra.mrb[2].mxu0 %vm311_vm0, %v1115_v11  ;;  %v5570_v11 = vpop.permute.xlu1 %5569 }
 0x145   : > { %4986 = vmatpush3.bf16.msk.msra.mxu0 %vm6349_vm1, %v4981_v2  ;;  %4583 = vmatprep.mubr.msk.f32.mxu0 %vm311_vm0, %v1233_v17  ;;  %v1597_v2 = vld [vmem:[#allocation5 + $0x168] sm:$0xff]  ;;  %v5572_v16 = vunpack.i.h.bf16 %v5570_v11  ;;  %v5571_v17 = vunpack.i.l.bf16 %v5570_v11 }
 0x146   : > { %4989 = vmatprep.subr.msk.bf16.mxu0 %vm6364_vm5, %v4987_v13 }
 0x147   : > { %v5041_v24 = vpack.c.bf16 %v5572_v16, %v5571_v17 }
 0x148   : > { %4584 = vmatmul.mubr.msk.f32.vlgmr.msra.gmra.mrb[0].mxu0 %vm311_vm0, %v1234_v21  ;;  %v3625_v21 = vld [vmem:[#allocation7 + $0x1b8] sm:$0xff] }
 0x149   : > { %4992 = vmatpush3.bf16.msk.msra.mxu0 %vm6364_vm5, %v4987_v13  ;;  %4586 = vmatprep.mubr.msk.f32.mxu0 %vm311_vm0, %v1235_v25  ;;  %v1599_v13 = vld [vmem:[#allocation5 + $0x178] sm:$0xff] }
 0x14a   : > { %4995 = vmatprep.subr.msk.bf16.mxu0 %vm6364_vm5, %v4993_v22 }
 0x14c   : > { %4587 = vmatmul.mubr.msk.f32.gmra.mrb[2].mxu0 %vm311_vm0, %v1236_v27  ;;  %v1719_v27 = vld [vmem:[#allocation5 + $0x190] sm:$0xff] }
 0x14d   : > { %4998 = vmatpush3.bf16.msk.msra.mxu0 %vm6364_vm5, %v4993_v22  ;;  %4597 = vmatprep.mubr.msk.f32.mxu0 %vm311_vm0, %v1354_v32  ;;  %v5575_v22 = vpop.permute.xlu0 %5574 }
 0x14e   : > { %5001 = vmatprep.subr.msk.bf16.mxu0 %vm6381_vm9, %v4999_v29  ;;  %v5577_v25 = vunpack.i.h.bf16 %v5575_v22  ;;  %v5576_v26 = vunpack.i.l.bf16 %v5575_v22 }
 0x150   : > { %4598 = vmatmul.mubr.msk.f32.vlgmr.msra.gmra.mrb[0].mxu0 %vm311_vm0, %v1355_v36  ;;  %v5047_v31 = vpack.c.bf16 %v5577_v25, %v5576_v26  ;;  %v1838_v36 = vld [vmem:[#allocation5 + $0x1a0] sm:$0xff] }
 0x151   : > { %5004 = vmatpush3.bf16.msk.msra.mxu0 %vm6381_vm9, %v4999_v29  ;;  %4600 = vmatprep.mubr.msk.f32.mxu0 %vm311_vm0, %v1356_v40  ;;  %v5580_v29 = vpop.permute.xlu1 %5579  ;;  %v1841_v40 = vld [vmem:[#allocation5 + $0x1b8] sm:$0xff]  ;;  %v2071_v46 = vpop.permute.xlu0 %2070 }
 0x152   : > { %5007 = vmatprep.subr.msk.bf16.mxu0 %vm6381_vm9, %v5005_v37  ;;  %v5582_v32 = vunpack.i.h.bf16 %v5580_v29  ;;  %v5581_v35 = vunpack.i.l.bf16 %v5580_v29 }
 0x154   : > { %4601 = vmatmul.mubr.msk.f32.gmra.mrb[2].mxu0 %vm311_vm0, %v1357_v43  ;;  %v5053_v38 = vpack.c.bf16 %v5582_v32, %v5581_v35  ;;  %v1960_v43 = vld [vmem:[#allocation5 + $0x1c8] sm:$0xff] }
 0x155   : > { %5010 = vmatpush3.bf16.msk.msra.mxu0 %vm6381_vm9, %v5005_v37  ;;  %4611 = vmatprep.mubr.msk.f32.mxu0 %vm311_vm0, %v1475_v48  ;;  %v2076_v48 = vpop.permute.xlu1 %2075 }
 0x156   : > { %5013 = vmatprep.subr.msk.bf16.mxu0 %vm6398_vm13, %v5011_v44 }
 0x158   : > { %4612 = vmatmul.mubr.msk.f32.vlgmr.msra.gmra.mrb[0].mxu0 %vm311_vm0, %v1476_v51 }
 0x159   : > { %5016 = vmatpush3.bf16.msk.msra.mxu0 %vm6398_vm13, %v5011_v44  ;;  %4614 = vmatprep.mubr.msk.f32.mxu0 %vm311_vm0, %v1477_v55  ;;  %v1961_v44 = vld [vmem:[#allocation5 + $0x1d0] sm:$0xff]  ;;  %v2086_v55 = vpop.permute.xlu0 %2085 }
 0x15a   : > { %5019 = vmatprep.subr.msk.bf16.mxu0 %vm6398_vm13, %v5017_v52 }
 0x15c   : > { %4615 = vmatmul.mubr.msk.f32.gmra.mrb[2].mxu0 %vm311_vm0, %v1478_v57 }
 0x15d   : > { %5022 = vmatpush3.bf16.msk.msra.mxu0 %vm6398_vm13, %v5017_v52  ;;  %4625 = vmatprep.mubr.msk.f32.mxu0 %vm311_vm0, %v1596_v62  ;;  %v2125_v62 = vld [vmem:[#allocation7 + $0x20] sm:$0xff] }
 0x15e   : > { %5025 = vmatprep.subr.msk.bf16.mxu0 %vm6415_vm3, %v5023_v58  ;;  %4681 = vmatprep.mubr.msk.f32.mxu1 %vm311_vm0, %v2125_v62 }
 0x160   : > { %4626 = vmatmul.mubr.msk.f32.vlgmr.msra.gmra.mrb[0].mxu0 %vm311_vm0, %v1597_v2 }
 0x161   : > { %5028 = vmatpush3.bf16.msk.msra.mxu0 %vm6415_vm3, %v5023_v58  ;;  %4628 = vmatprep.mubr.msk.f32.mxu0 %vm311_vm0, %v1598_v10  ;;  %v2081_v58 = vpop.permute.xlu1 %2080 }
 0x162   : > { %5031 = vmatprep.subr.msk.bf16.mxu0 %vm6415_vm3, %v5029_v5 }
 0x164   : > { %4629 = vmatmul.mubr.msk.f32.gmra.mrb[2].mxu0 %vm311_vm0, %v1599_v13 }
 0x165   : > { %5034 = vmatpush3.bf16.msk.msra.mxu0 %vm6415_vm3, %v5029_v5  ;;  %4639 = vmatprep.mubr.msk.f32.mxu0 %vm311_vm0, %v1717_v20 }
 0x166   : > { %5037 = vmatprep.subr.msk.bf16.mxu0 %vm6432_vm11, %v5035_v15 }
 0x168   : > { %4640 = vmatmul.mubr.msk.f32.vlgmr.msra.gmra.mrb[0].mxu0 %vm311_vm0, %v1718_v23 }
 0x169   : > { %5040 = vmatpush3.bf16.msk.msra.mxu0 %vm6432_vm11, %v5035_v15  ;;  %4642 = vmatprep.mubr.msk.f32.mxu0 %vm311_vm0, %v1719_v27 }
 0x16a   : > { %5043 = vmatprep.subr.msk.bf16.mxu0 %vm6432_vm11, %v5041_v24 }
 0x16c   : > { %4643 = vmatmul.mubr.msk.f32.gmra.mrb[2].mxu0 %vm311_vm0, %v1720_v30 }
 0x16d   : > { %5046 = vmatpush3.bf16.msk.msra.mxu0 %vm6432_vm11, %v5041_v24  ;;  %4653 = vmatprep.mubr.msk.f32.mxu0 %vm311_vm0, %v1838_v36 }
 0x16e   : > { %5049 = vmatprep.subr.msk.bf16.mxu0 %vm6449_vm7, %v5047_v31 }
 0x170   : > { %4654 = vmatmul.mubr.msk.f32.vlgmr.msra.gmra.mrb[0].mxu0 %vm311_vm0, %v1839_v12 }
 0x171   : > { %5052 = vmatpush3.bf16.msk.msra.mxu0 %vm6449_vm7, %v5047_v31  ;;  %4656 = vmatprep.mubr.msk.f32.mxu0 %vm311_vm0, %v1840_v39  ;;  %v2127_v31 = vld [vmem:[#allocation7 + $0x30] sm:$0xff] }
 0x172   : > { %5055 = vmatprep.subr.msk.bf16.mxu0 %vm6449_vm7, %v5053_v38 }
 0x174   : > { %4657 = vmatmul.mubr.msk.f32.gmra.mrb[2].mxu0 %vm311_vm0, %v1841_v40 }
 0x175   : > { %5058 = vmatpush3.bf16.msk.msra.mxu0 %vm6449_vm7, %v5053_v38  ;;  %4667 = vmatprep.mubr.msk.f32.mxu0 %vm311_vm0, %v1959_v41  ;;  %v2128_v38 = vld [vmem:[#allocation7 + $0x38] sm:$0xff] }
 0x178   : > { %4668 = vmatmul.mubr.msk.f32.vlgmr.msra.gmra.mrb[0].mxu0 %vm311_vm0, %v1960_v43 }
 0x179   : > { %4670 = vmatprep.mubr.msk.f32.mxu0 %vm311_vm0, %v1961_v44  ;;  %v2109_v44 = vld [vmem:[#allocation7 + $0x8] sm:$0xff] }
 0x17c   : > { %4671 = vmatmul.mubr.msk.f32.gmra.mrb[2].mxu0 %vm311_vm0, %v1962_v45  ;;  %v2110_v45 = vld [vmem:[#allocation7 + $0x10] sm:$0xff] }
 0x24b   : > { %v4669_v50 = vpop.f32.mrb[0].mxu0 }
 0x24c   : > { %v2089_v51 = vadd.f32 %v4669_v50, %v2076_v48  ;;  %v2041_v52 = vpop.f32.mrb[1].mxu0 }
 0x24d   : > { %v2088_v53 = vadd.f32 %v2071_v46, %v2041_v52  ;;  %v2336_v52 = vld [vmem:[#allocation7 + $0x40] sm:$0xff] }
 0x24e   : > { %v2093_v54 = vmax.f32 %v2089_v51, 0.0 }
 0x24f   : > { %v2092_v56 = vmax.f32 %v2088_v53, 0.0  ;;  %v4672_v57 = vpop.f32.mrb[2].mxu0 }
 0x250   : > { %v2091_v59 = vadd.f32 %v4672_v57, %v2086_v55  ;;  %v2051_v61 = vpop.f32.mrb[3].mxu0  ;;  %v2337_v57 = vld [vmem:[#allocation7 + $0x48] sm:$0xff] }
 0x251   : > { %v2090_v1 = vadd.f32 %v2081_v58, %v2051_v61  ;;  %v5585_v2 = vpack.i.bf16 %v2093_v54, %v2092_v56  ;;  %v6476_v10 = vpack.c.bf16 %v2093_v54, %v2092_v56  ;;  %v2338_v58 = vld [vmem:[#allocation7 + $0x50] sm:$0xff] }
 0x252   : > { %v2095_v5 = vmax.f32 %v2091_v59, 0.0 }
 0x253   : > { %v2094_v7 = vmax.f32 %v2090_v1, 0.0  ;;  %5586 = vrot.lane.b32.xlu1 %v5585_v2, %s5921_s21 }
 0x255   : > { %v5590_v9 = vpack.i.bf16 %v2095_v5, %v2094_v7  ;;  %v6478_v11 = vpack.c.bf16 %v2095_v5, %v2094_v7 }
 0x257   : > { %5596 = vrot.lane.b32.xlu1 %v5585_v2, %s5922_s23  ;;  %5591 = vrot.lane.b32.xlu0 %v5590_v9, %s5921_s21  ;;  %s3867_s21 = sshll.u32 %s6506_s30, 4  ;;  %s6694_s21 = int_to_ptr.vmem [resolvable:$true] %s3867_s21 }
 0x25b   : > { %5606 = vrot.lane.b32.xlu1 %v5585_v2, %s5923_s14  ;;  %5601 = vrot.lane.b32.xlu0 %v5590_v9, %s5922_s23  ;;  %s4222_s23 = sshll.u32 %s5985_s19, 10  ;;  %s5936_s19 = smov [#allocation10]  }
 0x25f   : > { %5616 = vrot.lane.b32.xlu1 %v5585_v2, %s5924_s20  ;;  %5611 = vrot.lane.b32.xlu0 %v5590_v9, %s5923_s14 }
 0x263   : > { %5626 = vrot.lane.b32.xlu1 %v5585_v2, %s5925_s6  ;;  %5621 = vrot.lane.b32.xlu0 %v5590_v9, %s5924_s20 }
 0x267   : > { %5636 = vrot.lane.b32.xlu1 %v5585_v2, %s5926_s8  ;;  %5631 = vrot.lane.b32.xlu0 %v5590_v9, %s5925_s6  ;;  %s6700_s6 = scalar_lea.hbm %s6749_s4, %s4222_s23 }
 0x26b   : > { %5646 = vrot.lane.b32.xlu1 %v5585_v2, %s5927_s9  ;;  %5641 = vrot.lane.b32.xlu0 %v5590_v9, %s5926_s8  ;;  %s3854_s8 = scalar_lea.sflag [#allocation4], %s6168_s11 }
 0x26f   : > { %5656 = vrot.lane.b32.xlu1 %v5585_v2, %s5928_s28  ;;  %5651 = vrot.lane.b32.xlu0 %v5590_v9, %s5927_s9  ;;  %s5839_s9 = scalar_lea.vmem %s6694_s21, 1024 }
 0x270   : > { %p5840_p0 = scmp.ne.s32.totalorder %s6694_s21, %s5839_s9 }
 0x272   : > { %p5841_p3 = pnand %p5840_p0, %p6117_p5 }
 0x273   : > { %5666 = vrot.lane.b32.xlu1 %v5585_v2, %s5929_s29  ;;  %5661 = vrot.lane.b32.xlu0 %v5590_v9, %s5928_s28  ;;  %s5843_s28 = sshll.u32 %s5936_s19, 4  ;;  %s5844_s28 = int_to_ptr.vmem [resolvable:$false] %s5843_s28 }
 0x274   : > { %p5842_p7 = pneg %p5841_p3  ;;  %p5846_p11 = scmp.lt.s32.totalorder %s6694_s21, %s5844_s28 }
 0x277   : > { %5676 = vrot.lane.b32.xlu1 %v5585_v2, %s5930_s24  ;;  %5671 = vrot.lane.b32.xlu0 %v5590_v9, %s5929_s29  ;;  %s5845_s29 = scalar_lea.vmem %s5844_s28, 2048 }
 0x278   : > { %p5847_p1 = scmp.lt.s32.totalorder %s5845_s29, %s5839_s9 }
 0x27a   : > { %p5848_p2 = por %p5847_p1, %p5846_p11 }
 0x27b   : > { %5686 = vrot.lane.b32.xlu1 %v5585_v2, %s5931_s5  ;;  %5681 = vrot.lane.b32.xlu0 %v5590_v9, %s5930_s24 }
 0x27c   : > { %p5849_p4 = pnand %p5848_p2, %p5842_p7 }
 0x27f   : > { %5696 = vrot.lane.b32.xlu1 %v5585_v2, %s5932_s7  ;;  %5691 = vrot.lane.b32.xlu0 %v5590_v9, %s5931_s5 }
 0x283   : > { %5706 = vrot.lane.b32.xlu1 %v5585_v2, %s5933_s26  ;;  %5701 = vrot.lane.b32.xlu0 %v5590_v9, %s5932_s7 }
 0x287   : > { %5716 = vrot.lane.b32.xlu1 %v5585_v2, %s5934_s25  ;;  %5711 = vrot.lane.b32.xlu0 %v5590_v9, %s5933_s26  ;;  %v2454_v2 = vld [vmem:[#allocation7 + $0x60] sm:$0xff] }
 0x28b   : > { %5721 = vrot.lane.b32.xlu0 %v5590_v9, %s5934_s25 }
 0x2c5   : > { %v5587_v13 = vpop.permute.xlu1 %5586 }
 0x2c6   : > { %v5589_v15 = vunpack.i.h.bf16 %v5587_v13  ;;  %v5588_v16 = vunpack.i.l.bf16 %v5587_v13 }
 0x2c8   : > { %v5059_v17 = vpack.c.bf16 %v5589_v15, %v5588_v16  ;;  %v2455_v15 = vld [vmem:[#allocation7 + $0x68] sm:$0xff]  ;;  %v2456_v16 = vld [vmem:[#allocation7 + $0x70] sm:$0xff] }
 0x2c9   : > { %v5597_v20 = vpop.permute.xlu1 %5596  ;;  %v5592_v22 = vpop.permute.xlu0 %5591 }
 0x2ca   : > { %v5599_v23 = vunpack.i.h.bf16 %v5597_v20  ;;  %v5598_v24 = vunpack.i.l.bf16 %v5597_v20  ;;  %v5594_v25 = vunpack.i.h.bf16 %v5592_v22  ;;  %v5593_v26 = vunpack.i.l.bf16 %v5592_v22  ;;  %5061 = vmatprep.subr.msk.bf16.mxu1 %vm6228_vm2, %v5059_v17 }
 0x2cb   : > { %5064 = vmatpush3.bf16.msk.msra.mxu1 %vm6228_vm2, %v5059_v17 }
 0x2cc   : > { %v5065_v27 = vpack.c.bf16 %v5594_v25, %v5593_v26  ;;  %v5071_v29 = vpack.c.bf16 %v5599_v23, %v5598_v24  ;;  %v2572_v24 = vld [vmem:[#allocation7 + $0x80] sm:$0xff] }
 0x2cd   : > { %v5602_v3 = vpop.permute.xlu0 %5601  ;;  %v5607_v6 = vpop.permute.xlu1 %5606 }
 0x2ce   : > { %v5604_v4 = vunpack.i.h.bf16 %v5602_v3  ;;  %v5603_v30 = vunpack.i.l.bf16 %v5602_v3  ;;  %5067 = vmatprep.subr.msk.bf16.mxu1 %vm6228_vm2, %v5065_v27  ;;  %v5609_v32 = vunpack.i.h.bf16 %v5607_v6  ;;  %v5608_v35 = vunpack.i.l.bf16 %v5607_v6 }
 0x2cf   : > { %5070 = vmatpush3.bf16.msk.msra.mxu1 %vm6228_vm2, %v5065_v27 }
 0x2d0   : > { %5073 = vmatprep.subr.msk.bf16.mxu1 %vm6237_vm4, %v5071_v29  ;;  %v5077_v36 = vpack.c.bf16 %v5604_v4, %v5603_v30  ;;  %v5083_v39 = vpack.c.bf16 %v5609_v32, %v5608_v35  ;;  %v2574_v4 = vld [vmem:[#allocation7 + $0x90] sm:$0xff]  ;;  %v2690_v32 = vld [vmem:[#allocation7 + $0xa0] sm:$0xff] }
 0x2d1   : > { %v5612_v12 = vpop.permute.xlu0 %5611  ;;  %v5617_v43 = vpop.permute.xlu1 %5616 }
 0x2d2   : > { %4682 = vmatmul.mubr.msk.f32.vlgmr.msra.gmra.mrb[0].mxu1 %vm311_vm0, %v2126_v8  ;;  %v5614_v40 = vunpack.i.h.bf16 %v5612_v12  ;;  %v5613_v41 = vunpack.i.l.bf16 %v5612_v12  ;;  %v5619_v46 = vunpack.i.h.bf16 %v5617_v43  ;;  %v5618_v48 = vunpack.i.l.bf16 %v5617_v43  ;;  %v2809_v43 = vld [vmem:[#allocation7 + $0xc8] sm:$0xff] }
 0x2d3   : > { %5076 = vmatpush3.bf16.msk.msra.mxu1 %vm6237_vm4, %v5071_v29  ;;  %4684 = vmatprep.mubr.msk.f32.mxu1 %vm311_vm0, %v2127_v31  ;;  %v2573_v29 = vld [vmem:[#allocation7 + $0x88] sm:$0xff] }
 0x2d4   : > { %5079 = vmatprep.subr.msk.bf16.mxu1 %vm6237_vm4, %v5077_v36  ;;  %v5089_v50 = vpack.c.bf16 %v5614_v40, %v5613_v41  ;;  %v5095_v53 = vpack.c.bf16 %v5619_v46, %v5618_v48  ;;  %v2693_v40 = vld [vmem:[#allocation7 + $0xb8] sm:$0xff] }
 0x2d5   : > { %v5622_v51 = vpop.permute.xlu0 %5621  ;;  %v5627_v56 = vpop.permute.xlu1 %5626 }
 0x2d6   : > { %4685 = vmatmul.mubr.msk.f32.gmra.mrb[2].mxu1 %vm311_vm0, %v2128_v38  ;;  %v5624_v54 = vunpack.i.h.bf16 %v5622_v51  ;;  %v5623_v55 = vunpack.i.l.bf16 %v5622_v51  ;;  %v5629_v59 = vunpack.i.h.bf16 %v5627_v56  ;;  %v5628_v61 = vunpack.i.l.bf16 %v5627_v56  ;;  %v2691_v38 = vld [vmem:[#allocation7 + $0xa8] sm:$0xff] }
 0x2d7   : > { %5082 = vmatpush3.bf16.msk.msra.mxu1 %vm6237_vm4, %v5077_v36  ;;  %4695 = vmatprep.mubr.msk.f32.mxu1 %vm311_vm0, %v2108_v19  ;;  %v2692_v19 = vld [vmem:[#allocation7 + $0xb0] sm:$0xff] }
 0x2d8   : > { %5085 = vmatprep.subr.msk.bf16.mxu1 %vm6254_vm6, %v5083_v39  ;;  %v5101_v62 = vpack.c.bf16 %v5624_v54, %v5623_v55  ;;  %v5107_v5 = vpack.c.bf16 %v5629_v59, %v5628_v61  ;;  %v2915_v54 = vld [vmem:[#allocation7 + $0xe8] sm:$0xff]  ;;  %v2917_v59 = vld [vmem:[#allocation7 + $0xf8] sm:$0xff] }
 0x2d9   : > { %v5632_v1 = vpop.permute.xlu0 %5631  ;;  %v5637_v13 = vpop.permute.xlu1 %5636 }
 0x2da   : > { %4696 = vmatmul.mubr.msk.f32.vlgmr.msra.gmra.mrb[0].mxu1 %vm311_vm0, %v2109_v44  ;;  %v5634_v7 = vunpack.i.h.bf16 %v5632_v1  ;;  %v5633_v9 = vunpack.i.l.bf16 %v5632_v1  ;;  %v5639_v17 = vunpack.i.h.bf16 %v5637_v13  ;;  %v5638_v20 = vunpack.i.l.bf16 %v5637_v13  ;;  %v2810_v44 = vld [vmem:[#allocation7 + $0xd0] sm:$0xff] }
 0x2db   : > { %5088 = vmatpush3.bf16.msk.msra.mxu1 %vm6254_vm6, %v5083_v39  ;;  %4698 = vmatprep.mubr.msk.f32.mxu1 %vm311_vm0, %v2110_v45 }
 0x2dc   : > { %5091 = vmatprep.subr.msk.bf16.mxu1 %vm6254_vm6, %v5089_v50  ;;  %v5113_v22 = vpack.c.bf16 %v5634_v7, %v5633_v9  ;;  %v5119_v25 = vpack.c.bf16 %v5639_v17, %v5638_v20 }
 0x2dd   : > { %v5642_v23 = vpop.permute.xlu0 %5641  ;;  %v5647_v3 = vpop.permute.xlu1 %5646 }
 0x2de   : > { %4699 = vmatmul.mubr.msk.f32.gmra.mrb[2].mxu1 %vm311_vm0, %v2111_v34  ;;  %v5644_v26 = vunpack.i.h.bf16 %v5642_v23  ;;  %v5643_v27 = vunpack.i.l.bf16 %v5642_v23  ;;  %v5649_v30 = vunpack.i.h.bf16 %v5647_v3  ;;  %v5648_v6 = vunpack.i.l.bf16 %v5647_v3 }
 0x2df   : > { %5094 = vmatpush3.bf16.msk.msra.mxu1 %vm6254_vm6, %v5089_v50  ;;  %4709 = vmatprep.mubr.msk.f32.mxu1 %vm311_vm0, %v2336_v52  ;;  %v2811_v50 = vld [vmem:[#allocation7 + $0xd8] sm:$0xff] }
 0x2e0   : > { %5097 = vmatprep.subr.msk.bf16.mxu1 %vm6271_vm8, %v5095_v53  ;;  %v5125_v8 = vpack.c.bf16 %v5644_v26, %v5643_v27  ;;  %v5131_v35 = vpack.c.bf16 %v5649_v30, %v5648_v6 }
 0x2e1   : > { %v5652_v31 = vpop.permute.xlu0 %5651  ;;  %v5657_v41 = vpop.permute.xlu1 %5656 }
 0x2e2   : > { %4710 = vmatmul.mubr.msk.f32.vlgmr.msra.gmra.mrb[0].mxu1 %vm311_vm0, %v2337_v57  ;;  %v5654_v36 = vunpack.i.h.bf16 %v5652_v31  ;;  %v5653_v12 = vunpack.i.l.bf16 %v5652_v31  ;;  %v5659_v45 = vunpack.i.h.bf16 %v5657_v41  ;;  %v5658_v46 = vunpack.i.l.bf16 %v5657_v41  ;;  %v3269_v31 = vld [vmem:[#allocation7 + $0x148] sm:$0xff] }
 0x2e3   : > { %5100 = vmatpush3.bf16.msk.msra.mxu1 %vm6271_vm8, %v5095_v53  ;;  %4712 = vmatprep.mubr.msk.f32.mxu1 %vm311_vm0, %v2338_v58  ;;  %v3387_v41 = vld [vmem:[#allocation7 + $0x168] sm:$0xff] }
 0x2e4   : > { %5103 = vmatprep.subr.msk.bf16.mxu1 %vm6271_vm8, %v5101_v62  ;;  %v5137_v39 = vpack.c.bf16 %v5654_v36, %v5653_v12  ;;  %v5151_v51 = vpack.c.bf16 %v5659_v45, %v5658_v46 }
 0x2e5   : > { %v5662_v48 = vpop.permute.xlu0 %5661  ;;  %v5667_v53 = vpop.permute.xlu1 %5666 }
 0x2e6   : > { %4713 = vmatmul.mubr.msk.f32.gmra.mrb[2].mxu1 %vm311_vm0, %v2339_v47  ;;  %v5664_v34 = vunpack.i.h.bf16 %v5662_v48  ;;  %v5663_v52 = vunpack.i.l.bf16 %v5662_v48  ;;  %v5669_v55 = vunpack.i.h.bf16 %v5667_v53  ;;  %v5668_v56 = vunpack.i.l.bf16 %v5667_v53  ;;  %v3505_v53 = vld [vmem:[#allocation7 + $0x188] sm:$0xff] }
 0x2e7   : > { %5106 = vmatpush3.bf16.msk.msra.mxu1 %vm6271_vm8, %v5101_v62  ;;  %4723 = vmatprep.mubr.msk.f32.mxu1 %vm311_vm0, %v2454_v2  ;;  %v3033_v2 = vld [vmem:[#allocation7 + $0x108] sm:$0xff] }
 0x2e8   : > { %5109 = vmatprep.subr.msk.bf16.mxu1 %vm6288_vm10, %v5107_v5  ;;  %v5157_v57 = vpack.c.bf16 %v5664_v34, %v5663_v52  ;;  %v5163_v61 = vpack.c.bf16 %v5669_v55, %v5668_v56 }
 0x2e9   : > { %v5672_v58 = vpop.permute.xlu0 %5671  ;;  %v5677_v47 = vpop.permute.xlu1 %5676 }
 0x2ea   : > { %4724 = vmatmul.mubr.msk.f32.vlgmr.msra.gmra.mrb[0].mxu1 %vm311_vm0, %v2455_v15  ;;  %v5674_v62 = vunpack.i.h.bf16 %v5672_v58  ;;  %v5673_v1 = vunpack.i.l.bf16 %v5672_v58  ;;  %v5679_v7 = vunpack.i.h.bf16 %v5677_v47  ;;  %v5678_v9 = vunpack.i.l.bf16 %v5677_v47  ;;  %v3622_v58 = vld [vmem:[#allocation7 + $0x1a0] sm:$0xff] }
 0x2eb   : > { %5112 = vmatpush3.bf16.msk.msra.mxu1 %vm6288_vm10, %v5107_v5  ;;  %4726 = vmatprep.mubr.msk.f32.mxu1 %vm311_vm0, %v2456_v16  ;;  %v3034_v5 = vld [vmem:[#allocation7 + $0x110] sm:$0xff]  ;;  %v3150_v16 = vld [vmem:[#allocation7 + $0x120] sm:$0xff] }
 0x2ec   : > { %5115 = vmatprep.subr.msk.bf16.mxu1 %vm6288_vm10, %v5113_v22  ;;  %v5169_v13 = vpack.c.bf16 %v5674_v62, %v5673_v1  ;;  %v5175_v17 = vpack.c.bf16 %v5679_v7, %v5678_v9  ;;  %v3623_v62 = vld [vmem:[#allocation7 + $0x1a8] sm:$0xff]  ;;  %v3624_v1 = vld [vmem:[#allocation7 + $0x1b0] sm:$0xff]  ;;  %v3743_v9 = vld [vmem:[#allocation7 + $0x1d8] sm:$0xff] }
 0x2ed   : > { %v5682_v15 = vpop.permute.xlu0 %5681  ;;  %v5687_v23 = vpop.permute.xlu1 %5686  ;;  %v3742_v7 = vld [vmem:[#allocation7 + $0x1d0] sm:$0xff] }
 0x2ee   : > { %4727 = vmatmul.mubr.msk.f32.gmra.mrb[2].mxu1 %vm311_vm0, %v2457_v60  ;;  %v5684_v20 = vunpack.i.h.bf16 %v5682_v15  ;;  %v3151_v60 = vld [vmem:[#allocation7 + $0x128] sm:$0xff]  ;;  %v5688_v26 = vunpack.i.l.bf16 %v5687_v23 }
 0x2ef   : > { %5118 = vmatpush3.bf16.msk.msra.mxu1 %vm6288_vm10, %v5113_v22  ;;  %4737 = vmatprep.mubr.msk.f32.mxu1 %vm311_vm0, %v2572_v24  ;;  %v5683_v22 = vunpack.i.l.bf16 %v5682_v15  ;;  %v3152_v24 = vld [vmem:[#allocation7 + $0x130] sm:$0xff] }
 0x2f0   : > { %5121 = vmatprep.subr.msk.bf16.mxu1 %vm6305_vm12, %v5119_v25 }
 0x2f1   : > { %v5181_v27 = vpack.c.bf16 %v5684_v20, %v5683_v22  ;;  %v5692_v3 = vpop.permute.xlu0 %5691 }
 0x2f2   : > { %4738 = vmatmul.mubr.msk.f32.vlgmr.msra.gmra.mrb[0].mxu1 %vm311_vm0, %v2573_v29  ;;  %v3268_v29 = vld [vmem:[#allocation7 + $0x140] sm:$0xff]  ;;  %v5694_v30 = vunpack.i.h.bf16 %v5692_v3  ;;  %v5693_v6 = vunpack.i.l.bf16 %v5692_v3 }
 0x2f3   : > { %5124 = vmatpush3.bf16.msk.msra.mxu1 %vm6305_vm12, %v5119_v25  ;;  %4740 = vmatprep.mubr.msk.f32.mxu1 %vm311_vm0, %v2574_v4  ;;  %v5689_v25 = vunpack.i.h.bf16 %v5687_v23 }
 0x2f4   : > { %5127 = vmatprep.subr.msk.bf16.mxu1 %vm6305_vm12, %v5125_v8  ;;  %v5193_v36 = vpack.c.bf16 %v5694_v30, %v5693_v6 }
 0x2f5   : > { %v5187_v4 = vpack.c.bf16 %v5689_v25, %v5688_v26  ;;  %v5702_v12 = vpop.permute.xlu0 %5701 }
 0x2f6   : > { %4741 = vmatmul.mubr.msk.f32.gmra.mrb[2].mxu1 %vm311_vm0, %v2575_v14  ;;  %v3270_v14 = vld [vmem:[#allocation7 + $0x150] sm:$0xff] }
 0x2f7   : > { %5130 = vmatpush3.bf16.msk.msra.mxu1 %vm6305_vm12, %v5125_v8  ;;  %4751 = vmatprep.mubr.msk.f32.mxu1 %vm311_vm0, %v2690_v32  ;;  %v5697_v8 = vpop.permute.xlu1 %5696 }
 0x2f8   : > { %5133 = vmatprep.subr.msk.bf16.mxu1 %vm6322_vm14, %v5131_v35  ;;  %v5699_v32 = vunpack.i.h.bf16 %v5697_v8 }
 0x2f9   : > { %v5712_v48 = vpop.permute.xlu0 %5711 }
 0x2fa   : > { %4752 = vmatmul.mubr.msk.f32.vlgmr.msra.gmra.mrb[0].mxu1 %vm311_vm0, %v2691_v38  ;;  %v3386_v38 = vld [vmem:[#allocation7 + $0x160] sm:$0xff]  ;;  %v5713_v34 = vunpack.i.l.bf16 %v5712_v48 }
 0x2fb   : > { %5136 = vmatpush3.bf16.msk.msra.mxu1 %vm6322_vm14, %v5131_v35  ;;  %4754 = vmatprep.mubr.msk.f32.mxu1 %vm311_vm0, %v2692_v19  ;;  %v5698_v35 = vunpack.i.l.bf16 %v5697_v8 }
 0x2fc   : > { %5139 = vmatprep.subr.msk.bf16.mxu1 %vm6322_vm14, %v5137_v39 }
 0x2fd   : > { %v5199_v19 = vpack.c.bf16 %v5699_v32, %v5698_v35 }
 0x2fe   : > { %4755 = vmatmul.mubr.msk.f32.gmra.mrb[2].mxu1 %vm311_vm0, %v2693_v40  ;;  %v5703_v40 = vunpack.i.l.bf16 %v5702_v12 }
 0x2ff   : > { %5142 = vmatpush3.bf16.msk.msra.mxu1 %vm6322_vm14, %v5137_v39  ;;  %4765 = vmatprep.mubr.msk.f32.mxu1 %vm311_vm0, %v2808_v28  ;;  %v5704_v39 = vunpack.i.h.bf16 %v5702_v12  ;;  %v5707_v28 = vpop.permute.xlu1 %5706 }
 0x300   : > { %5144 = vmatprep.subr.bf16.mxu1 %v6476_v10  ;;  %v5708_v45 = vunpack.i.l.bf16 %v5707_v28 }
 0x301   : > { %v5205_v46 = vpack.c.bf16 %v5704_v39, %v5703_v40 }
 0x302   : > { %4766 = vmatmul.mubr.msk.f32.vlgmr.msra.gmra.mrb[0].mxu1 %vm311_vm0, %v2809_v43  ;;  %v3388_v43 = vld [vmem:[#allocation7 + $0x170] sm:$0xff] }
 0x303   : > { %5146 = vmatpush3.bf16.msra.mxu1 %v6476_v10  ;;  %4768 = vmatprep.mubr.msk.f32.mxu1 %vm311_vm0, %v2810_v44  ;;  %v2916_v10 = vld [vmem:[#allocation7 + $0xf0] sm:$0xff]  ;;  %v5709_v44 = vunpack.i.h.bf16 %v5707_v28  ;;  %v5717_v52 = vpop.permute.xlu1 %5716 }
 0x304   : > { %5148 = vmatprep.subr.bf16.mxu1 %v6478_v11  ;;  %v5718_v55 = vunpack.i.l.bf16 %v5717_v52 }
 0x306   : > { %4769 = vmatmul.mubr.msk.f32.gmra.mrb[2].mxu1 %vm311_vm0, %v2811_v50  ;;  %v3504_v50 = vld [vmem:[#allocation7 + $0x180] sm:$0xff] }
 0x307   : > { %5150 = vmatpush3.bf16.msra.mxu1 %v6478_v11  ;;  %4779 = vmatprep.mubr.msk.f32.mxu1 %vm311_vm0, %v2914_v42  ;;  %v3032_v11 = vld [vmem:[#allocation7 + $0x100] sm:$0xff]  ;;  %v5211_v42 = vpack.c.bf16 %v5709_v44, %v5708_v45 }
 0x308   : > { %5153 = vmatprep.subr.msk.bf16.mxu1 %vm6349_vm1, %v5151_v51 }
 0x30a   : > { %4780 = vmatmul.mubr.msk.f32.vlgmr.msra.gmra.mrb[0].mxu1 %vm311_vm0, %v2915_v54  ;;  %v3506_v54 = vld [vmem:[#allocation7 + $0x190] sm:$0xff] }
 0x30b   : > { %5156 = vmatpush3.bf16.msk.msra.mxu1 %vm6349_vm1, %v5151_v51  ;;  %4782 = vmatprep.mubr.msk.f32.mxu1 %vm311_vm0, %v2916_v10  ;;  %v5714_v51 = vunpack.i.h.bf16 %v5712_v48  ;;  %v5719_v10 = vunpack.i.h.bf16 %v5717_v52 }
 0x30c   : > { %5159 = vmatprep.subr.msk.bf16.mxu1 %vm6349_vm1, %v5157_v57 }
 0x30d   : > { %v5217_v56 = vpack.c.bf16 %v5714_v51, %v5713_v34 }
 0x30e   : > { %4783 = vmatmul.mubr.msk.f32.gmra.mrb[2].mxu1 %vm311_vm0, %v2917_v59  ;;  %v5223_v59 = vpack.c.bf16 %v5719_v10, %v5718_v55 }
 0x30f   : > { %5162 = vmatpush3.bf16.msk.msra.mxu1 %vm6349_vm1, %v5157_v57  ;;  %4793 = vmatprep.mubr.msk.f32.mxu1 %vm311_vm0, %v3032_v11  ;;  %v5722_v57 = vpop.permute.xlu0 %5721 }
 0x310   : > { %5165 = vmatprep.subr.msk.bf16.mxu1 %vm6364_vm5, %v5163_v61  ;;  %v5724_v11 = vunpack.i.h.bf16 %v5722_v57 }
 0x312   : > { %4794 = vmatmul.mubr.msk.f32.vlgmr.msra.gmra.mrb[0].mxu1 %vm311_vm0, %v3033_v2  ;;  %v3740_v2 = vld [vmem:[#allocation7 + $0x1c0] sm:$0xff] }
 0x313   : > { %5168 = vmatpush3.bf16.msk.msra.mxu1 %vm6364_vm5, %v5163_v61  ;;  %4796 = vmatprep.mubr.msk.f32.mxu1 %vm311_vm0, %v3034_v5  ;;  %v5723_v61 = vunpack.i.l.bf16 %v5722_v57  ;;  %v3741_v5 = vld [vmem:[#allocation7 + $0x1c8] sm:$0xff] }
 0x314   : > { %5171 = vmatprep.subr.msk.bf16.mxu1 %vm6364_vm5, %v5169_v13 }
 0x315   : > { %v5229_v47 = vpack.c.bf16 %v5724_v11, %v5723_v61 }
 0x316   : > { %4797 = vmatmul.mubr.msk.f32.gmra.mrb[2].mxu1 %vm311_vm0, %v3035_v63 }
 0x317   : > { %5174 = vmatpush3.bf16.msk.msra.mxu1 %vm6364_vm5, %v5169_v13  ;;  %4807 = vmatprep.mubr.msk.f32.mxu1 %vm311_vm0, %v3150_v16 }
 0x318   : > { %5177 = vmatprep.subr.msk.bf16.mxu1 %vm6381_vm9, %v5175_v17 }
 0x31a   : > { %4808 = vmatmul.mubr.msk.f32.vlgmr.msra.gmra.mrb[0].mxu1 %vm311_vm0, %v3151_v60 }
 0x31b   : > { %5180 = vmatpush3.bf16.msk.msra.mxu1 %vm6381_vm9, %v5175_v17  ;;  %4810 = vmatprep.mubr.msk.f32.mxu1 %vm311_vm0, %v3152_v24 }
 0x31c   : > { %5183 = vmatprep.subr.msk.bf16.mxu1 %vm6381_vm9, %v5181_v27 }
 0x31e   : > { %4811 = vmatmul.mubr.msk.f32.gmra.mrb[2].mxu1 %vm311_vm0, %v3153_v18 }
 0x31f   : > { %5186 = vmatpush3.bf16.msk.msra.mxu1 %vm6381_vm9, %v5181_v27  ;;  %4821 = vmatprep.mubr.msk.f32.mxu1 %vm311_vm0, %v3268_v29 }
 0x320   : > { %5189 = vmatprep.subr.msk.bf16.mxu1 %vm6398_vm13, %v5187_v4 }
 0x322   : > { %4822 = vmatmul.mubr.msk.f32.vlgmr.msra.gmra.mrb[0].mxu1 %vm311_vm0, %v3269_v31 }
 0x323   : > { %5192 = vmatpush3.bf16.msk.msra.mxu1 %vm6398_vm13, %v5187_v4  ;;  %4824 = vmatprep.mubr.msk.f32.mxu1 %vm311_vm0, %v3270_v14 }
 0x324   : > { %5195 = vmatprep.subr.msk.bf16.mxu1 %vm6398_vm13, %v5193_v36 }
 0x326   : > { %4825 = vmatmul.mubr.msk.f32.gmra.mrb[2].mxu1 %vm311_vm0, %v3271_v33 }
 0x327   : > { %5198 = vmatpush3.bf16.msk.msra.mxu1 %vm6398_vm13, %v5193_v36  ;;  %4835 = vmatprep.mubr.msk.f32.mxu1 %vm311_vm0, %v3386_v38 }
 0x328   : > { %5201 = vmatprep.subr.msk.bf16.mxu1 %vm6415_vm3, %v5199_v19 }
 0x32a   : > { %4836 = vmatmul.mubr.msk.f32.vlgmr.msra.gmra.mrb[0].mxu1 %vm311_vm0, %v3387_v41 }
 0x32b   : > { %5204 = vmatpush3.bf16.msk.msra.mxu1 %vm6415_vm3, %v5199_v19  ;;  %4838 = vmatprep.mubr.msk.f32.mxu1 %vm311_vm0, %v3388_v43 }
 0x32c   : > { %5207 = vmatprep.subr.msk.bf16.mxu1 %vm6415_vm3, %v5205_v46 }
 0x32e   : > { %4839 = vmatmul.mubr.msk.f32.gmra.mrb[2].mxu1 %vm311_vm0, %v3389_v49 }
 0x32f   : > { %5210 = vmatpush3.bf16.msk.msra.mxu1 %vm6415_vm3, %v5205_v46  ;;  %4849 = vmatprep.mubr.msk.f32.mxu1 %vm311_vm0, %v3504_v50 }
 0x330   : > { %5213 = vmatprep.subr.msk.bf16.mxu1 %vm6432_vm11, %v5211_v42 }
 0x332   : > { %4850 = vmatmul.mubr.msk.f32.vlgmr.msra.gmra.mrb[0].mxu1 %vm311_vm0, %v3505_v53 }
 0x333   : > { %5216 = vmatpush3.bf16.msk.msra.mxu1 %vm6432_vm11, %v5211_v42  ;;  %4852 = vmatprep.mubr.msk.f32.mxu1 %vm311_vm0, %v3506_v54 }
 0x334   : > { %5219 = vmatprep.subr.msk.bf16.mxu1 %vm6432_vm11, %v5217_v56 }
 0x336   : > { %4853 = vmatmul.mubr.msk.f32.gmra.mrb[2].mxu1 %vm311_vm0, %v3507_v0 }
 0x337   : > { %5222 = vmatpush3.bf16.msk.msra.mxu1 %vm6432_vm11, %v5217_v56  ;;  %4863 = vmatprep.mubr.msk.f32.mxu1 %vm311_vm0, %v3622_v58 }
 0x338   : > { %5225 = vmatprep.subr.msk.bf16.mxu1 %vm6449_vm7, %v5223_v59 }
 0x33a   : > { %4864 = vmatmul.mubr.msk.f32.vlgmr.msra.gmra.mrb[0].mxu1 %vm311_vm0, %v3623_v62 }
 0x33b   : > { %5228 = vmatpush3.bf16.msk.msra.mxu1 %vm6449_vm7, %v5223_v59  ;;  %4866 = vmatprep.mubr.msk.f32.mxu1 %vm311_vm0, %v3624_v1 }
 0x33c   : > { %5231 = vmatprep.subr.msk.bf16.mxu1 %vm6449_vm7, %v5229_v47 }
 0x33e   : > { %4867 = vmatmul.mubr.msk.f32.gmra.mrb[2].mxu1 %vm311_vm0, %v3625_v21 }
 0x33f   : > { %5234 = vmatpush3.bf16.msk.msra.mxu1 %vm6449_vm7, %v5229_v47  ;;  %4877 = vmatprep.mubr.msk.f32.mxu1 %vm311_vm0, %v3740_v2 }
 0x342   : > { %4878 = vmatmul.mubr.msk.f32.vlgmr.msra.gmra.mrb[0].mxu1 %vm311_vm0, %v3741_v5 }
 0x343   : > { %4880 = vmatprep.mubr.msk.f32.mxu1 %vm311_vm0, %v3742_v7 }
 0x346   : > { %4881 = vmatmul.mubr.msk.f32.gmra.mrb[2].mxu1 %vm311_vm0, %v3743_v9 }
 0x415   : > { %v4879_v13 = vpop.f32.mrb[0].mxu1 }
 0x416   : > { %3848 = vst [vmem:[%s6506_s30 + $0x18] sm:$0xff] %v4879_v13  ;;  %v3822_v37 = vpop.f32.mrb[1].mxu1 }
 0x417   : > { %3846 = vst [vmem:[%s6506_s30 + $0x8] sm:$0xff] %v3822_v37 }
 0x419   : > { %v4882_v15 = vpop.f32.mrb[2].mxu1 }
 0x41a   : > { %3852 = vst [vmem:[%s6506_s30 + $0x38] sm:$0xff] %v4882_v15  ;;  %v3832_v63 = vpop.f32.mrb[3].mxu1 }
 0x41b   : > { %3850 = vst [vmem:[%s6506_s30 + $0x28] sm:$0xff] %v3832_v63 }
 0x41c   : > { %5852 = shalt.err (!%p5849_p4)
}
 0x41d   : > { %s5853_s24 = scalar_lea.hbm %s6700_s6, 1024  ;;  %s5857_s26 = scalar_lea.hbm %s6749_s4, 4096 }
 0x41e   : > { %p5854_p9 = scmp.ne.s32.totalorder %s6700_s6, %s5853_s24  ;;  %p5858_p10 = scmp.lt.u32.totalorder %s6700_s6, %s6749_s4 }
 0x41f   : > { %p5859_p12 = scmp.lt.u32.totalorder %s5857_s26, %s5853_s24  ;;  %p5861_p0 = scmp.lt.u32.totalorder %s5853_s24, %s6700_s6 }
 0x420   : > { %p5855_p13 = pnand %p5854_p9, %p6117_p5 }
 0x421   : > { %p5860_p6 = por %p5859_p12, %p5858_p10 }
 0x422   : > { %p5856_p8 = pneg %p5855_p13 }
 0x423   : > { %p5862_p3 = por %p5861_p0, %p5860_p6 }
 0x425   : > { %p5863_p7 = pnand %p5862_p3, %p5856_p8 }
 0x427   : > { %5866 = shalt.err (!%p5863_p7)
}
 0x428   : > { %s5937_s30 = smov 128   ;;  %s5938_s23 = smov 8  }
 0x429   : > { %5361 = dma.vmem_to_hbm [thread:$0]  (%p6117_p5), %s6694_s21, 1024, %s6700_s6, %s3854_s8, %s5937_s30, %s5937_s30, %s5938_s23  }
 0x42a PF: > { %p5388_p11 = scmp.ge.s32.totalorder %s5913_s18, 2  ;;  %s3882_s14 = sand.u32 1, %s5901_s15  }
 0x42b   : > { %p6795_p1 = scmp.ne.s32.totalorder %s6754_s22, 0  ;;  %s3883_s20 = scalar_lea.sflag [#allocation4], %s3882_s14 }
 0x42d   : > { %p5378_p2 = pnand %p5388_p11, %p6795_p1 }
 0x42f   : > { %5896 = dma.done.wait (!%p5378_p2), %s3883_s20, 1024  }
 0x430   : > { %5898 = vsyncadd (!%p5378_p2), %s3883_s20, 4294966272  ;;  %p19_p4 = scmp.ge.s32.totalorder %s6103_s10, 6   ;;  %s6796_s15 = smov %s5905_s16 }
 0x431   : > { %s6797_s16 = smov %s5909_s17  ;;  %s6798_s17 = smov %s6113_s12 }
 0x432   : > { %s6799_s18 = smov %s6103_s10  ;;  %21 = sbr.rel (!%p19_p4) target bundleno = 7 (0x7), region = 121 }
 0x439   :  { %3888 = vsyncpa [#allocation3], 1 }
 0x43a   :  { %3890 = vsyncpa [#allocation3 + $0x1], 1 }
 0x43b   :  { %3891 = vsyncpa [#allocation6], 1 }
 0x43c   :  { %3892 = vsyncpa [#allocation9], 1 }
 0x43d   :  { %3893 = vsyncpa [#allocation4], 1 }
 0x43e   :  { %3895 = vsyncpa [#allocation4 + $0x1], 1 }

</bundles_post_ra>
